<compile_context>
chip_gen: v7x
topology: tpu7x:2x2x1
jax: 0.10.0
libtpu: 0.0.40
codegen_flags: <defaults>
</compile_context>

<pallas_src>
import math
import functools

import jax
import jax.numpy as jnp
import numpy as np
from jax.experimental import pallas as pl
from jax.experimental.pallas import tpu as pltpu


def _layernorm(x, w, b, eps=1e-5):
    mu = jnp.mean(x, axis=-1, keepdims=True)
    var = jnp.mean((x - mu) ** 2, axis=-1, keepdims=True)
    return (x - mu) * jax.lax.rsqrt(var + eps) * w + b


def _pick_hidden_chunk(h4, cap=2048):
    """Largest hidden-axis chunk <= cap that divides 4E (multiple of 128)."""
    if h4 <= cap:
        return h4
    for c in range(cap, 127, -128):
        if h4 % c == 0:
            return c
    return h4


def _residual_block_kernel(num_heads, hidden_chunk,
                           q_ref, kp_ref, vp_ref,
                           ln1w_ref, ln1b_ref,
                           wq_ref, bq_ref,
                           wo_ref, bo_ref,
                           w1_ref, b1_ref, w2_ref, b2_ref,
                           ln2w_ref, ln2b_ref,
                           mask_ref,
                           o_ref):
    f32 = jnp.float32
    cdt = wq_ref.dtype                        # bf16 MXU operand dtype

    q = q_ref[...].astype(f32)                # (TL, E) residual path stays f32
    kp = kp_ref[...]                          # (S, E) bf16 projected K (per batch)
    vp = vp_ref[...]                          # (S, E) bf16 projected V (per batch)

    TL, E = q.shape
    S = kp.shape[0]
    H = num_heads
    dh = E // H

    # ---- norm1(q); 1/sqrt(dh) folded into Wq/bq at prep time ----
    qn = _layernorm(q, ln1w_ref[...], ln1b_ref[...])
    qp = jnp.dot(qn.astype(cdt), wq_ref[...], preferred_element_type=f32) + bq_ref[...]
    qp_c = qp.astype(cdt)

    if dh % 128 == 0:
        # Lane-dense per-head path: each head contracts over dh and emits dh
        # output columns (no H-fold MXU redundancy), batched over heads.
        qh = qp_c.reshape(TL, H, dh)
        kh = kp.reshape(S, H, dh)
        vh = vp.reshape(S, H, dh)
        sc = jnp.einsum("qhd,shd->hqs", qh, kh, preferred_element_type=f32)
        sc = sc - jnp.max(sc, axis=-1, keepdims=True)
        pr = jnp.exp(sc)                      # TODO(synk): bf16 exp on v6e/v7x would
        pr = pr * pl.reciprocal(jnp.sum(pr, axis=-1, keepdims=True), approx=True)
        ctx = jnp.einsum("hqs,shd->qhd", pr.astype(cdt), vh,
                         preferred_element_type=f32).reshape(TL, E)
    else:
        # Small-dh (demo) path: full-lane-width masked matmuls.  Mask Q for the
        # scores and the PV output columns; K/V stay untouched, so there is no
        # per-head (S, E) temporary and no H*S*E masking cost.
        def head_body(h, ctx):
            m = mask_ref[pl.ds(h, 1), :]                        # (1, E) f32 0/1
            qm = qp_c * m.astype(cdt)
            sc = jax.lax.dot_general(qm, kp, (((1,), (1,)), ((), ())),
                                     preferred_element_type=f32)  # (TL, S)
            sc = sc - jnp.max(sc, axis=-1, keepdims=True)
            p = jnp.exp(sc)                   # f32 exp (v5e has no bf16 EUP)
            p = p * pl.reciprocal(jnp.sum(p, axis=-1, keepdims=True), approx=True)
            pv = jnp.dot(p.astype(cdt), vp, preferred_element_type=f32)
            return ctx + pv * m               # head's columns land in place

        ctx = jax.lax.fori_loop(0, H, head_body, jnp.zeros((TL, E), f32),
                                unroll=True)

    # ---- attention out-projection (alpha folded into wo/bo at prep time) ----
    attn_out = jnp.dot(ctx.astype(cdt), wo_ref[...],
                       preferred_element_type=f32) + bo_ref[...]

    # TODO(synk): nn.Dropout layers are identity at inference; no stochastic drop here.
    out1 = q + attn_out

    # ---- FFN: Linear -> exact (erf) GELU -> Linear, chunked over the 4E axis ----
    H4 = w1_ref.shape[1]
    o1c = out1.astype(cdt)
    ffn = jnp.zeros((TL, E), f32)
    for lo in range(0, H4, hidden_chunk):     # static chunks (>=1 iteration)
        hi = lo + hidden_chunk
        hid = jnp.dot(o1c, w1_ref[:, lo:hi],
                      preferred_element_type=f32) + b1_ref[:, lo:hi]
        hid = 0.5 * hid * (1.0 + jax.lax.erf(hid * (1.0 / math.sqrt(2.0))))
        ffn = ffn + jnp.dot(hid.astype(cdt), w2_ref[lo:hi, :],
                            preferred_element_type=f32)
    ffn = ffn + b2_ref[...]

    # ---- norm2(out1 + ffn) ----
    out2 = _layernorm(out1 + ffn, ln2w_ref[...], ln2b_ref[...])
    o_ref[...] = out2.astype(o_ref.dtype)


def prepare_params(params, num_heads=8, compute_dtype=jnp.bfloat16):
    """One-time parameter prep: transpose weights, fold 1/sqrt(dh) into Wq/bq,
    fold alpha into the out-projection, cast in-kernel matmul weights to bf16,
    keep K/V projection weights in f32 for the XLA pre-pass, build head masks."""
    E = params["ln1_w"].shape[0]
    dh = E // num_heads
    scale = 1.0 / math.sqrt(dh)
    alpha = jnp.asarray(params["alpha"], jnp.float32)

    Wq, Wk, Wv = jnp.split(params["in_proj_w"], 3, axis=0)       # each (E, E)
    bq, bk, bv = jnp.split(params["in_proj_b"], 3, axis=0)       # each (E,)

    row = lambda x: jnp.asarray(x, jnp.float32).reshape(1, -1)
    wmat = lambda x: jnp.asarray(x, compute_dtype)

    head_mask = ((jnp.arange(E)[None, :] // dh) ==
                 jnp.arange(num_heads)[:, None]).astype(jnp.float32)   # (H, E)

    return dict(
        ln1_w=row(params["ln1_w"]), ln1_b=row(params["ln1_b"]),
        # Q projection (in-kernel): softmax scale folded in, bf16 weights.
        wq=wmat(Wq.T * scale), bq=row(bq) * scale,
        # K/V projections run once per call in an XLA pre-pass -> f32 weights.
        wk=jnp.asarray(Wk.T, jnp.float32), bk=row(bk),
        wv=jnp.asarray(Wv.T, jnp.float32), bv=row(bv),
        # Residual scale alpha folded into the attention out-projection.
        wo=wmat(params["out_proj_w"].T * alpha),
        bo=row(params["out_proj_b"]) * alpha,
        w1=wmat(params["ffn_w1"].T), b1=row(params["ffn_b1"]),
        w2=wmat(params["ffn_w2"].T), b2=row(params["ffn_b2"]),
        ln2_w=row(params["ln2_w"]), ln2_b=row(params["ln2_b"]),
        head_mask=head_mask,
    )


def altered_residual_block(q, k, v, prepared, num_heads=8, q_tile=512,
                           single_buffer_weights=None):
    L, N, E = q.shape
    S = k.shape[0]
    assert E % num_heads == 0
    p = prepared
    cdt = p["wq"].dtype

    # ---- XLA pre-pass: K/V projections computed once per call (not per q
    # tile), f32 matmul, bf16 result emitted directly in (N, S, E) layout. ----
    kp = (jnp.einsum("sne,ef->nsf", k, p["wk"]) + p["bk"]).astype(cdt)
    vp = (jnp.einsum("sne,ef->nsf", v, p["wv"]) + p["bv"]).astype(cdt)

    # TODO(synk): q/out keep one (L,N,E)<->(N,L,E) transpose each; indexing the
    # seq-major layout directly needs a size-1 block on the second-minor batch
    # axis, which we have not validated against Mosaic's (8,128) block rules.
    q3 = jnp.transpose(q, (1, 0, 2))          # (N, L, E) f32

    TL = L if L <= q_tile else q_tile         # q-token tile (mult. of 8 or full L)
    nqt = pl.cdiv(L, TL)
    hidden_chunk = _pick_hidden_chunk(4 * E)
    assert (4 * E) % hidden_chunk == 0

    # ---- VMEM budget: derive from the actual chip, leave ~16 MiB headroom ----
    try:
        vmem_cap = pltpu.get_tpu_info().vmem_capacity_bytes
    except Exception:
        vmem_cap = 64 * 2**20                 # conservative (v7x) fallback
    weight_bytes = sum(p[n].size * p[n].dtype.itemsize
                       for n in ("wq", "wo", "w1", "w2"))
    if single_buffer_weights is None:
        single_buffer_weights = 2 * weight_bytes > vmem_cap // 3
    wbuf = 1 if single_buffer_weights else 2
    n_score = num_heads if (E // num_heads) % 128 == 0 else 1
    act_bytes = (2 * TL * E * 4                 # q blocks (double-buffered)
                 + 2 * 2 * S * E * 2            # kp/vp blocks
                 + 2 * TL * E * 4               # out blocks
                 + 6 * TL * E * 4               # qp/ctx/out1/ffn f32 temporaries
                 + 2 * n_score * TL * S * 4     # score / prob slabs
                 + 2 * TL * hidden_chunk * 4)   # FFN hidden chunk
    est = wbuf * weight_bytes + act_bytes + (4 << 20)
    vmem_limit = int(min(max(est, 32 << 20), vmem_cap - (16 << 20)))

    def bc(a):  # resident broadcast block (weights / biases)
        if single_buffer_weights:
            # constant block index -> single-buffer on VMEM-tight parts (v7x)
            return pl.BlockSpec(a.shape, lambda n, i: (0,) * a.ndim,
                                pipeline_mode=pl.Buffered(1))
        return pl.BlockSpec(a.shape, lambda n, i: (0,) * a.ndim)

    in_specs = [
        pl.BlockSpec((None, TL, E), lambda n, i: (n, i, 0)),    # q tile
        pl.BlockSpec((None, S, E), lambda n, i: (n, 0, 0)),     # projected K
        pl.BlockSpec((None, S, E), lambda n, i: (n, 0, 0)),     # projected V
        bc(p["ln1_w"]), bc(p["ln1_b"]),
        bc(p["wq"]), bc(p["bq"]),
        bc(p["wo"]), bc(p["bo"]),
        bc(p["w1"]), bc(p["b1"]), bc(p["w2"]), bc(p["b2"]),
        bc(p["ln2_w"]), bc(p["ln2_b"]),
        bc(p["head_mask"]),
    ]

    # TODO(synk): for very long KV on v7x, tile the S axis with an online
    # (flash-style) softmax instead of holding full (S, E) K/V resident.
    kern = functools.partial(_residual_block_kernel, num_heads, hidden_chunk)
    out = pl.pallas_call(
        kern,
        grid=(N, nqt),
        out_shape=jax.ShapeDtypeStruct((N, L, E), jnp.float32),
        in_specs=in_specs,
        out_specs=pl.BlockSpec((None, TL, E), lambda n, i: (n, i, 0)),
        compiler_params=pltpu.CompilerParams(
            dimension_semantics=("parallel", "parallel"),
            vmem_limit_bytes=vmem_limit),
    )(q3, kp, vp,
      p["ln1_w"], p["ln1_b"],
      p["wq"], p["bq"],
      p["wo"], p["bo"],
      p["w1"], p["b1"], p["w2"], p["b2"],
      p["ln2_w"], p["ln2_b"],
      p["head_mask"])

    return jnp.transpose(out, (1, 0, 2))      # back to (L, N, E)


def init_params(key, dim):
    ks = jax.random.split(key, 5)
    E = dim
    return dict(
        ln1_w=jnp.ones((E,), jnp.float32),
        ln1_b=jnp.zeros((E,), jnp.float32),
        in_proj_w=0.05 * jax.random.normal(ks[0], (3 * E, E), jnp.float32),
        in_proj_b=0.05 * jax.random.normal(ks[1], (3 * E,), jnp.float32),
        out_proj_w=0.05 * jax.random.normal(ks[2], (E, E), jnp.float32),
        out_proj_b=jnp.zeros((E,), jnp.float32),
        ffn_w1=0.05 * jax.random.normal(ks[3], (4 * E, E), jnp.float32),
        ffn_b1=jnp.zeros((4 * E,), jnp.float32),
        ffn_w2=0.05 * jax.random.normal(ks[4], (E, 4 * E), jnp.float32),
        ffn_b2=jnp.zeros((E,), jnp.float32),
        ln2_w=jnp.ones((E,), jnp.float32),
        ln2_b=jnp.zeros((E,), jnp.float32),
        alpha=jnp.float32(1.0),
    )


def reference(q, k, v, params, num_heads=8):
    """Pure-JAX f32 reference mirroring the PyTorch forward (eval mode)."""
    L, N, E = q.shape
    S = k.shape[0]
    Dh = E // num_heads
    ln = lambda x, w, b: _layernorm(x, w, b)

    qn = ln(q, params["ln1_w"], params["ln1_b"])
    Wq, Wk, Wv = jnp.split(params["in_proj_w"], 3, axis=0)
    bq, bk, bv = jnp.split(params["in_proj_b"], 3, axis=0)
    qp = qn @ Wq.T + bq
    kp = k @ Wk.T + bk
    vp = v @ Wv.T + bv
    qh = qp.reshape(L, N, num_heads, Dh).transpose(1, 2, 0, 3)
    kh = kp.reshape(S, N, num_heads, Dh).transpose(1, 2, 0, 3)
    vh = vp.reshape(S, N, num_heads, Dh).transpose(1, 2, 0, 3)
    sc = jnp.einsum("nhld,nhsd->nhls", qh, kh) / math.sqrt(Dh)
    pr = jax.nn.softmax(sc, axis=-1)
    ctx = jnp.einsum("nhls,nhsd->nhld", pr, vh)
    ctx = ctx.transpose(2, 0, 1, 3).reshape(L, N, E)
    attn_out = ctx @ params["out_proj_w"].T + params["out_proj_b"]
    out1 = q + params["alpha"] * attn_out
    hid = out1 @ params["ffn_w1"].T + params["ffn_b1"]
    hid = 0.5 * hid * (1.0 + jax.lax.erf(hid / math.sqrt(2.0)))
    ffn = hid @ params["ffn_w2"].T + params["ffn_b2"]
    return ln(out1 + ffn, params["ln2_w"], params["ln2_b"])


if __name__ == "__main__":
    L, S, N, E = 8, 8, 2, 64   # seq_q, seq_kv, batch, dim (dim % num_heads == 0)
    num_heads = 8
    key = jax.random.PRNGKey(0)
    kq, kk, kv, kparam = jax.random.split(key, 4)
    q = jax.random.normal(kq, (L, N, E), jnp.float32)
    k = jax.random.normal(kk, (S, N, E), jnp.float32)
    v = jax.random.normal(kv, (S, N, E), jnp.float32)

    params = init_params(kparam, E)
    prepared = prepare_params(params, num_heads)          # one-time weight prep

    run = jax.jit(functools.partial(altered_residual_block, num_heads=num_heads))
    out = jax.block_until_ready(run(q, k, v, prepared))

    ref = reference(q, k, v, params, num_heads)
    # bf16 matmul operands with f32 accumulation vs pure-f32 reference
    np.testing.assert_allclose(np.asarray(out), np.asarray(ref), rtol=2e-2, atol=2e-2)
    print("KERNEL_OK")
</pallas_src>

<mosaic_0001>
module attributes {stable_mosaic.version = 11 : i64} {
  func.func @_residual_block_kernel(%arg0: i32, %arg1: i32, %arg2: memref<1x8x64xf32, #tpu.memory_space<vmem>>, %arg3: memref<1x8x64xbf16, #tpu.memory_space<vmem>>, %arg4: memref<1x8x64xbf16, #tpu.memory_space<vmem>>, %arg5: memref<1x64xf32, #tpu.memory_space<vmem>>, %arg6: memref<1x64xf32, #tpu.memory_space<vmem>>, %arg7: memref<64x64xbf16, #tpu.memory_space<vmem>>, %arg8: memref<1x64xf32, #tpu.memory_space<vmem>>, %arg9: memref<64x64xbf16, #tpu.memory_space<vmem>>, %arg10: memref<1x64xf32, #tpu.memory_space<vmem>>, %arg11: memref<64x256xbf16, #tpu.memory_space<vmem>>, %arg12: memref<1x256xf32, #tpu.memory_space<vmem>>, %arg13: memref<256x64xbf16, #tpu.memory_space<vmem>>, %arg14: memref<1x64xf32, #tpu.memory_space<vmem>>, %arg15: memref<1x64xf32, #tpu.memory_space<vmem>>, %arg16: memref<1x64xf32, #tpu.memory_space<vmem>>, %arg17: memref<8x64xf32, #tpu.memory_space<vmem>>, %arg18: memref<1x8x64xf32, #tpu.memory_space<vmem>>) attributes {dimension_semantics = [#tpu.dimension_semantics<parallel>, #tpu.dimension_semantics<parallel>], iteration_bounds = array<i64: 2, 1>, scalar_prefetch = 0 : i64, scratch_operands = 0 : i64, tpu.core_type = #tpu.core_type<tc>, window_params = [{transform_indices = @transform_0, window_bounds = array<i64: 1, 8, 64>}, {transform_indices = @transform_1, window_bounds = array<i64: 1, 8, 64>}, {transform_indices = @transform_2, window_bounds = array<i64: 1, 8, 64>}, {pipeline_mode = #tpu.pipeline_mode<synchronous>, transform_indices = @transform_3, window_bounds = array<i64: 1, 64>}, {pipeline_mode = #tpu.pipeline_mode<synchronous>, transform_indices = @transform_4, window_bounds = array<i64: 1, 64>}, {pipeline_mode = #tpu.pipeline_mode<synchronous>, transform_indices = @transform_5, window_bounds = array<i64: 64, 64>}, {pipeline_mode = #tpu.pipeline_mode<synchronous>, transform_indices = @transform_6, window_bounds = array<i64: 1, 64>}, {pipeline_mode = #tpu.pipeline_mode<synchronous>, transform_indices = @transform_7, window_bounds = array<i64: 64, 64>}, {pipeline_mode = #tpu.pipeline_mode<synchronous>, transform_indices = @transform_8, window_bounds = array<i64: 1, 64>}, {pipeline_mode = #tpu.pipeline_mode<synchronous>, transform_indices = @transform_9, window_bounds = array<i64: 64, 256>}, {pipeline_mode = #tpu.pipeline_mode<synchronous>, transform_indices = @transform_10, window_bounds = array<i64: 1, 256>}, {pipeline_mode = #tpu.pipeline_mode<synchronous>, transform_indices = @transform_11, window_bounds = array<i64: 256, 64>}, {pipeline_mode = #tpu.pipeline_mode<synchronous>, transform_indices = @transform_12, window_bounds = array<i64: 1, 64>}, {pipeline_mode = #tpu.pipeline_mode<synchronous>, transform_indices = @transform_13, window_bounds = array<i64: 1, 64>}, {pipeline_mode = #tpu.pipeline_mode<synchronous>, transform_indices = @transform_14, window_bounds = array<i64: 1, 64>}, {pipeline_mode = #tpu.pipeline_mode<synchronous>, transform_indices = @transform_15, window_bounds = array<i64: 8, 64>}, {transform_indices = @transform_16, window_bounds = array<i64: 1, 8, 64>}]} {
    %c0 = arith.constant 0 : index
    %c0_0 = arith.constant 0 : index
    %c0_1 = arith.constant 0 : index
    %0 = vector.load %arg2[%c0, %c0_0, %c0_1] : memref<1x8x64xf32, #tpu.memory_space<vmem>>, vector<1x8x64xf32>
    %1 = vector.shape_cast %0 : vector<1x8x64xf32> to vector<8x64xf32>
    %c0_2 = arith.constant 0 : index
    %c0_3 = arith.constant 0 : index
    %c0_4 = arith.constant 0 : index
    %2 = vector.load %arg3[%c0_2, %c0_3, %c0_4] : memref<1x8x64xbf16, #tpu.memory_space<vmem>>, vector<1x8x64xbf16>
    %3 = vector.shape_cast %2 : vector<1x8x64xbf16> to vector<8x64xbf16>
    %c0_5 = arith.constant 0 : index
    %c0_6 = arith.constant 0 : index
    %c0_7 = arith.constant 0 : index
    %4 = vector.load %arg4[%c0_5, %c0_6, %c0_7] : memref<1x8x64xbf16, #tpu.memory_space<vmem>>, vector<1x8x64xbf16>
    %5 = vector.shape_cast %4 : vector<1x8x64xbf16> to vector<8x64xbf16>
    %c0_8 = arith.constant 0 : index
    %c0_9 = arith.constant 0 : index
    %6 = vector.load %arg5[%c0_8, %c0_9] : memref<1x64xf32, #tpu.memory_space<vmem>>, vector<1x64xf32>
    %c0_10 = arith.constant 0 : index
    %c0_11 = arith.constant 0 : index
    %7 = vector.load %arg6[%c0_10, %c0_11] : memref<1x64xf32, #tpu.memory_space<vmem>>, vector<1x64xf32>
    %cst = arith.constant dense<0.000000e+00> : vector<8xf32>
    %8 = vector.multi_reduction <add>, %1, %cst [1] : vector<8x64xf32> to vector<8xf32>
    %9 = vector.shape_cast %8 : vector<8xf32> to vector<8x1xf32>
    %cst_12 = arith.constant 6.400000e+01 : f32
    %10 = vector.broadcast %cst_12 : f32 to vector<8x1xf32>
    %11 = arith.divf %9, %10 : vector<8x1xf32>
    %12 = vector.broadcast %11 : vector<8x1xf32> to vector<8x64xf32>
    %13 = arith.subf %1, %12 : vector<8x64xf32>
    %14 = arith.mulf %13, %13 : vector<8x64xf32>
    %cst_13 = arith.constant dense<0.000000e+00> : vector<8xf32>
    %15 = vector.multi_reduction <add>, %14, %cst_13 [1] : vector<8x64xf32> to vector<8xf32>
    %16 = vector.shape_cast %15 : vector<8xf32> to vector<8x1xf32>
    %cst_14 = arith.constant 6.400000e+01 : f32
    %17 = vector.broadcast %cst_14 : f32 to vector<8x1xf32>
    %18 = arith.divf %16, %17 : vector<8x1xf32>
    %19 = vector.broadcast %11 : vector<8x1xf32> to vector<8x64xf32>
    %20 = arith.subf %1, %19 : vector<8x64xf32>
    %cst_15 = arith.constant 9.99999974E-6 : f32
    %21 = vector.broadcast %cst_15 : f32 to vector<8x1xf32>
    %22 = arith.addf %18, %21 : vector<8x1xf32>
    %23 = math.rsqrt %22 : vector<8x1xf32>
    %24 = vector.broadcast %23 : vector<8x1xf32> to vector<8x64xf32>
    %25 = arith.mulf %20, %24 : vector<8x64xf32>
    %26 = vector.broadcast %6 : vector<1x64xf32> to vector<8x64xf32>
    %27 = arith.mulf %25, %26 : vector<8x64xf32>
    %28 = vector.broadcast %7 : vector<1x64xf32> to vector<8x64xf32>
    %29 = arith.addf %27, %28 : vector<8x64xf32>
    %30 = arith.truncf %29 : vector<8x64xf32> to vector<8x64xbf16>
    %c0_16 = arith.constant 0 : index
    %c0_17 = arith.constant 0 : index
    %31 = vector.load %arg7[%c0_16, %c0_17] : memref<64x64xbf16, #tpu.memory_space<vmem>>, vector<64x64xbf16>
    %cst_18 = arith.constant dense<0.000000e+00> : vector<8x64xf32>
    %32 = tpu.matmul %30, %31, %cst_18 {dimension_numbers = #tpu.dot_dimension_numbers<[1], [0], [0], [1], [0, 0, 1, 1], [], []>} : vector<8x64xbf16>, vector<64x64xbf16>, vector<8x64xf32> -> vector<8x64xf32>
    %c0_19 = arith.constant 0 : index
    %c0_20 = arith.constant 0 : index
    %33 = vector.load %arg8[%c0_19, %c0_20] : memref<1x64xf32, #tpu.memory_space<vmem>>, vector<1x64xf32>
    %34 = vector.broadcast %33 : vector<1x64xf32> to vector<8x64xf32>
    %35 = arith.addf %32, %34 : vector<8x64xf32>
    %36 = arith.truncf %35 : vector<8x64xf32> to vector<8x64xbf16>
    %cst_21 = arith.constant 0.000000e+00 : f32
    %37 = vector.broadcast %cst_21 : f32 to vector<8x64xf32>
    %c0_i32 = arith.constant 0 : i32
    %38 = arith.index_cast %c0_i32 : i32 to index
    %c0_22 = arith.constant 0 : index
    %39 = vector.load %arg17[%38, %c0_22] : memref<8x64xf32, #tpu.memory_space<vmem>>, vector<1x64xf32>
    %40 = arith.truncf %39 : vector<1x64xf32> to vector<1x64xbf16>
    %41 = vector.broadcast %40 : vector<1x64xbf16> to vector<8x64xbf16>
    %42 = arith.mulf %36, %41 : vector<8x64xbf16>
    %cst_23 = arith.constant dense<0.000000e+00> : vector<8x8xf32>
    %43 = tpu.matmul %42, %3, %cst_23 {dimension_numbers = #tpu.dot_dimension_numbers<[1], [1], [0], [0], [0, 0, 1, 0], [], []>} : vector<8x64xbf16>, vector<8x64xbf16>, vector<8x8xf32> -> vector<8x8xf32>
    %cst_24 = arith.constant dense<0xFF800000> : vector<8xf32>
    %44 = vector.multi_reduction <maximumf>, %43, %cst_24 [1] : vector<8x8xf32> to vector<8xf32>
    %45 = vector.shape_cast %44 : vector<8xf32> to vector<8x1xf32>
    %46 = vector.broadcast %45 : vector<8x1xf32> to vector<8x8xf32>
    %47 = arith.subf %43, %46 : vector<8x8xf32>
    %48 = math.exp %47 : vector<8x8xf32>
    %cst_25 = arith.constant dense<0.000000e+00> : vector<8xf32>
    %49 = vector.multi_reduction <add>, %48, %cst_25 [1] : vector<8x8xf32> to vector<8xf32>
    %50 = vector.shape_cast %49 : vector<8xf32> to vector<8x1xf32>
    %51 = tpu.reciprocal %50 {approx = true} : vector<8x1xf32> -> vector<8x1xf32>
    %52 = vector.broadcast %51 : vector<8x1xf32> to vector<8x8xf32>
    %53 = arith.mulf %48, %52 : vector<8x8xf32>
    %54 = arith.truncf %53 : vector<8x8xf32> to vector<8x8xbf16>
    %cst_26 = arith.constant dense<0.000000e+00> : vector<8x64xf32>
    %55 = tpu.matmul %54, %5, %cst_26 {dimension_numbers = #tpu.dot_dimension_numbers<[1], [0], [0], [1], [0, 0, 1, 1], [], []>} : vector<8x8xbf16>, vector<8x64xbf16>, vector<8x64xf32> -> vector<8x64xf32>
    %56 = vector.broadcast %39 : vector<1x64xf32> to vector<8x64xf32>
    %57 = arith.mulf %55, %56 : vector<8x64xf32>
    %58 = arith.addf %37, %57 : vector<8x64xf32>
    %c1_i32 = arith.constant 1 : i32
    %59 = arith.index_cast %c1_i32 : i32 to index
    %c0_27 = arith.constant 0 : index
    %60 = vector.load %arg17[%59, %c0_27] : memref<8x64xf32, #tpu.memory_space<vmem>>, vector<1x64xf32>
    %61 = arith.truncf %60 : vector<1x64xf32> to vector<1x64xbf16>
    %62 = vector.broadcast %61 : vector<1x64xbf16> to vector<8x64xbf16>
    %63 = arith.mulf %36, %62 : vector<8x64xbf16>
    %cst_28 = arith.constant dense<0.000000e+00> : vector<8x8xf32>
    %64 = tpu.matmul %63, %3, %cst_28 {dimension_numbers = #tpu.dot_dimension_numbers<[1], [1], [0], [0], [0, 0, 1, 0], [], []>} : vector<8x64xbf16>, vector<8x64xbf16>, vector<8x8xf32> -> vector<8x8xf32>
    %cst_29 = arith.constant dense<0xFF800000> : vector<8xf32>
    %65 = vector.multi_reduction <maximumf>, %64, %cst_29 [1] : vector<8x8xf32> to vector<8xf32>
    %66 = vector.shape_cast %65 : vector<8xf32> to vector<8x1xf32>
    %67 = vector.broadcast %66 : vector<8x1xf32> to vector<8x8xf32>
    %68 = arith.subf %64, %67 : vector<8x8xf32>
    %69 = math.exp %68 : vector<8x8xf32>
    %cst_30 = arith.constant dense<0.000000e+00> : vector<8xf32>
    %70 = vector.multi_reduction <add>, %69, %cst_30 [1] : vector<8x8xf32> to vector<8xf32>
    %71 = vector.shape_cast %70 : vector<8xf32> to vector<8x1xf32>
    %72 = tpu.reciprocal %71 {approx = true} : vector<8x1xf32> -> vector<8x1xf32>
    %73 = vector.broadcast %72 : vector<8x1xf32> to vector<8x8xf32>
    %74 = arith.mulf %69, %73 : vector<8x8xf32>
    %75 = arith.truncf %74 : vector<8x8xf32> to vector<8x8xbf16>
    %cst_31 = arith.constant dense<0.000000e+00> : vector<8x64xf32>
    %76 = tpu.matmul %75, %5, %cst_31 {dimension_numbers = #tpu.dot_dimension_numbers<[1], [0], [0], [1], [0, 0, 1, 1], [], []>} : vector<8x8xbf16>, vector<8x64xbf16>, vector<8x64xf32> -> vector<8x64xf32>
    %77 = vector.broadcast %60 : vector<1x64xf32> to vector<8x64xf32>
    %78 = arith.mulf %76, %77 : vector<8x64xf32>
    %79 = arith.addf %58, %78 : vector<8x64xf32>
    %c2_i32 = arith.constant 2 : i32
    %80 = arith.index_cast %c2_i32 : i32 to index
    %c0_32 = arith.constant 0 : index
    %81 = vector.load %arg17[%80, %c0_32] : memref<8x64xf32, #tpu.memory_space<vmem>>, vector<1x64xf32>
    %82 = arith.truncf %81 : vector<1x64xf32> to vector<1x64xbf16>
    %83 = vector.broadcast %82 : vector<1x64xbf16> to vector<8x64xbf16>
    %84 = arith.mulf %36, %83 : vector<8x64xbf16>
    %cst_33 = arith.constant dense<0.000000e+00> : vector<8x8xf32>
    %85 = tpu.matmul %84, %3, %cst_33 {dimension_numbers = #tpu.dot_dimension_numbers<[1], [1], [0], [0], [0, 0, 1, 0], [], []>} : vector<8x64xbf16>, vector<8x64xbf16>, vector<8x8xf32> -> vector<8x8xf32>
    %cst_34 = arith.constant dense<0xFF800000> : vector<8xf32>
    %86 = vector.multi_reduction <maximumf>, %85, %cst_34 [1] : vector<8x8xf32> to vector<8xf32>
    %87 = vector.shape_cast %86 : vector<8xf32> to vector<8x1xf32>
    %88 = vector.broadcast %87 : vector<8x1xf32> to vector<8x8xf32>
    %89 = arith.subf %85, %88 : vector<8x8xf32>
    %90 = math.exp %89 : vector<8x8xf32>
    %cst_35 = arith.constant dense<0.000000e+00> : vector<8xf32>
    %91 = vector.multi_reduction <add>, %90, %cst_35 [1] : vector<8x8xf32> to vector<8xf32>
    %92 = vector.shape_cast %91 : vector<8xf32> to vector<8x1xf32>
    %93 = tpu.reciprocal %92 {approx = true} : vector<8x1xf32> -> vector<8x1xf32>
    %94 = vector.broadcast %93 : vector<8x1xf32> to vector<8x8xf32>
    %95 = arith.mulf %90, %94 : vector<8x8xf32>
    %96 = arith.truncf %95 : vector<8x8xf32> to vector<8x8xbf16>
    %cst_36 = arith.constant dense<0.000000e+00> : vector<8x64xf32>
    %97 = tpu.matmul %96, %5, %cst_36 {dimension_numbers = #tpu.dot_dimension_numbers<[1], [0], [0], [1], [0, 0, 1, 1], [], []>} : vector<8x8xbf16>, vector<8x64xbf16>, vector<8x64xf32> -> vector<8x64xf32>
    %98 = vector.broadcast %81 : vector<1x64xf32> to vector<8x64xf32>
    %99 = arith.mulf %97, %98 : vector<8x64xf32>
    %100 = arith.addf %79, %99 : vector<8x64xf32>
    %c3_i32 = arith.constant 3 : i32
    %101 = arith.index_cast %c3_i32 : i32 to index
    %c0_37 = arith.constant 0 : index
    %102 = vector.load %arg17[%101, %c0_37] : memref<8x64xf32, #tpu.memory_space<vmem>>, vector<1x64xf32>
    %103 = arith.truncf %102 : vector<1x64xf32> to vector<1x64xbf16>
    %104 = vector.broadcast %103 : vector<1x64xbf16> to vector<8x64xbf16>
    %105 = arith.mulf %36, %104 : vector<8x64xbf16>
    %cst_38 = arith.constant dense<0.000000e+00> : vector<8x8xf32>
    %106 = tpu.matmul %105, %3, %cst_38 {dimension_numbers = #tpu.dot_dimension_numbers<[1], [1], [0], [0], [0, 0, 1, 0], [], []>} : vector<8x64xbf16>, vector<8x64xbf16>, vector<8x8xf32> -> vector<8x8xf32>
    %cst_39 = arith.constant dense<0xFF800000> : vector<8xf32>
    %107 = vector.multi_reduction <maximumf>, %106, %cst_39 [1] : vector<8x8xf32> to vector<8xf32>
    %108 = vector.shape_cast %107 : vector<8xf32> to vector<8x1xf32>
    %109 = vector.broadcast %108 : vector<8x1xf32> to vector<8x8xf32>
    %110 = arith.subf %106, %109 : vector<8x8xf32>
    %111 = math.exp %110 : vector<8x8xf32>
    %cst_40 = arith.constant dense<0.000000e+00> : vector<8xf32>
    %112 = vector.multi_reduction <add>, %111, %cst_40 [1] : vector<8x8xf32> to vector<8xf32>
    %113 = vector.shape_cast %112 : vector<8xf32> to vector<8x1xf32>
    %114 = tpu.reciprocal %113 {approx = true} : vector<8x1xf32> -> vector<8x1xf32>
    %115 = vector.broadcast %114 : vector<8x1xf32> to vector<8x8xf32>
    %116 = arith.mulf %111, %115 : vector<8x8xf32>
    %117 = arith.truncf %116 : vector<8x8xf32> to vector<8x8xbf16>
    %cst_41 = arith.constant dense<0.000000e+00> : vector<8x64xf32>
    %118 = tpu.matmul %117, %5, %cst_41 {dimension_numbers = #tpu.dot_dimension_numbers<[1], [0], [0], [1], [0, 0, 1, 1], [], []>} : vector<8x8xbf16>, vector<8x64xbf16>, vector<8x64xf32> -> vector<8x64xf32>
    %119 = vector.broadcast %102 : vector<1x64xf32> to vector<8x64xf32>
    %120 = arith.mulf %118, %119 : vector<8x64xf32>
    %121 = arith.addf %100, %120 : vector<8x64xf32>
    %c4_i32 = arith.constant 4 : i32
    %122 = arith.index_cast %c4_i32 : i32 to index
    %c0_42 = arith.constant 0 : index
    %123 = vector.load %arg17[%122, %c0_42] : memref<8x64xf32, #tpu.memory_space<vmem>>, vector<1x64xf32>
    %124 = arith.truncf %123 : vector<1x64xf32> to vector<1x64xbf16>
    %125 = vector.broadcast %124 : vector<1x64xbf16> to vector<8x64xbf16>
    %126 = arith.mulf %36, %125 : vector<8x64xbf16>
    %cst_43 = arith.constant dense<0.000000e+00> : vector<8x8xf32>
    %127 = tpu.matmul %126, %3, %cst_43 {dimension_numbers = #tpu.dot_dimension_numbers<[1], [1], [0], [0], [0, 0, 1, 0], [], []>} : vector<8x64xbf16>, vector<8x64xbf16>, vector<8x8xf32> -> vector<8x8xf32>
    %cst_44 = arith.constant dense<0xFF800000> : vector<8xf32>
    %128 = vector.multi_reduction <maximumf>, %127, %cst_44 [1] : vector<8x8xf32> to vector<8xf32>
    %129 = vector.shape_cast %128 : vector<8xf32> to vector<8x1xf32>
    %130 = vector.broadcast %129 : vector<8x1xf32> to vector<8x8xf32>
    %131 = arith.subf %127, %130 : vector<8x8xf32>
    %132 = math.exp %131 : vector<8x8xf32>
    %cst_45 = arith.constant dense<0.000000e+00> : vector<8xf32>
    %133 = vector.multi_reduction <add>, %132, %cst_45 [1] : vector<8x8xf32> to vector<8xf32>
    %134 = vector.shape_cast %133 : vector<8xf32> to vector<8x1xf32>
    %135 = tpu.reciprocal %134 {approx = true} : vector<8x1xf32> -> vector<8x1xf32>
    %136 = vector.broadcast %135 : vector<8x1xf32> to vector<8x8xf32>
    %137 = arith.mulf %132, %136 : vector<8x8xf32>
    %138 = arith.truncf %137 : vector<8x8xf32> to vector<8x8xbf16>
    %cst_46 = arith.constant dense<0.000000e+00> : vector<8x64xf32>
    %139 = tpu.matmul %138, %5, %cst_46 {dimension_numbers = #tpu.dot_dimension_numbers<[1], [0], [0], [1], [0, 0, 1, 1], [], []>} : vector<8x8xbf16>, vector<8x64xbf16>, vector<8x64xf32> -> vector<8x64xf32>
    %140 = vector.broadcast %123 : vector<1x64xf32> to vector<8x64xf32>
    %141 = arith.mulf %139, %140 : vector<8x64xf32>
    %142 = arith.addf %121, %141 : vector<8x64xf32>
    %c5_i32 = arith.constant 5 : i32
    %143 = arith.index_cast %c5_i32 : i32 to index
    %c0_47 = arith.constant 0 : index
    %144 = vector.load %arg17[%143, %c0_47] : memref<8x64xf32, #tpu.memory_space<vmem>>, vector<1x64xf32>
    %145 = arith.truncf %144 : vector<1x64xf32> to vector<1x64xbf16>
    %146 = vector.broadcast %145 : vector<1x64xbf16> to vector<8x64xbf16>
    %147 = arith.mulf %36, %146 : vector<8x64xbf16>
    %cst_48 = arith.constant dense<0.000000e+00> : vector<8x8xf32>
    %148 = tpu.matmul %147, %3, %cst_48 {dimension_numbers = #tpu.dot_dimension_numbers<[1], [1], [0], [0], [0, 0, 1, 0], [], []>} : vector<8x64xbf16>, vector<8x64xbf16>, vector<8x8xf32> -> vector<8x8xf32>
    %cst_49 = arith.constant dense<0xFF800000> : vector<8xf32>
    %149 = vector.multi_reduction <maximumf>, %148, %cst_49 [1] : vector<8x8xf32> to vector<8xf32>
    %150 = vector.shape_cast %149 : vector<8xf32> to vector<8x1xf32>
    %151 = vector.broadcast %150 : vector<8x1xf32> to vector<8x8xf32>
    %152 = arith.subf %148, %151 : vector<8x8xf32>
    %153 = math.exp %152 : vector<8x8xf32>
    %cst_50 = arith.constant dense<0.000000e+00> : vector<8xf32>
    %154 = vector.multi_reduction <add>, %153, %cst_50 [1] : vector<8x8xf32> to vector<8xf32>
    %155 = vector.shape_cast %154 : vector<8xf32> to vector<8x1xf32>
    %156 = tpu.reciprocal %155 {approx = true} : vector<8x1xf32> -> vector<8x1xf32>
    %157 = vector.broadcast %156 : vector<8x1xf32> to vector<8x8xf32>
    %158 = arith.mulf %153, %157 : vector<8x8xf32>
    %159 = arith.truncf %158 : vector<8x8xf32> to vector<8x8xbf16>
    %cst_51 = arith.constant dense<0.000000e+00> : vector<8x64xf32>
    %160 = tpu.matmul %159, %5, %cst_51 {dimension_numbers = #tpu.dot_dimension_numbers<[1], [0], [0], [1], [0, 0, 1, 1], [], []>} : vector<8x8xbf16>, vector<8x64xbf16>, vector<8x64xf32> -> vector<8x64xf32>
    %161 = vector.broadcast %144 : vector<1x64xf32> to vector<8x64xf32>
    %162 = arith.mulf %160, %161 : vector<8x64xf32>
    %163 = arith.addf %142, %162 : vector<8x64xf32>
    %c6_i32 = arith.constant 6 : i32
    %164 = arith.index_cast %c6_i32 : i32 to index
    %c0_52 = arith.constant 0 : index
    %165 = vector.load %arg17[%164, %c0_52] : memref<8x64xf32, #tpu.memory_space<vmem>>, vector<1x64xf32>
    %166 = arith.truncf %165 : vector<1x64xf32> to vector<1x64xbf16>
    %167 = vector.broadcast %166 : vector<1x64xbf16> to vector<8x64xbf16>
    %168 = arith.mulf %36, %167 : vector<8x64xbf16>
    %cst_53 = arith.constant dense<0.000000e+00> : vector<8x8xf32>
    %169 = tpu.matmul %168, %3, %cst_53 {dimension_numbers = #tpu.dot_dimension_numbers<[1], [1], [0], [0], [0, 0, 1, 0], [], []>} : vector<8x64xbf16>, vector<8x64xbf16>, vector<8x8xf32> -> vector<8x8xf32>
    %cst_54 = arith.constant dense<0xFF800000> : vector<8xf32>
    %170 = vector.multi_reduction <maximumf>, %169, %cst_54 [1] : vector<8x8xf32> to vector<8xf32>
    %171 = vector.shape_cast %170 : vector<8xf32> to vector<8x1xf32>
    %172 = vector.broadcast %171 : vector<8x1xf32> to vector<8x8xf32>
    %173 = arith.subf %169, %172 : vector<8x8xf32>
    %174 = math.exp %173 : vector<8x8xf32>
    %cst_55 = arith.constant dense<0.000000e+00> : vector<8xf32>
    %175 = vector.multi_reduction <add>, %174, %cst_55 [1] : vector<8x8xf32> to vector<8xf32>
    %176 = vector.shape_cast %175 : vector<8xf32> to vector<8x1xf32>
    %177 = tpu.reciprocal %176 {approx = true} : vector<8x1xf32> -> vector<8x1xf32>
    %178 = vector.broadcast %177 : vector<8x1xf32> to vector<8x8xf32>
    %179 = arith.mulf %174, %178 : vector<8x8xf32>
    %180 = arith.truncf %179 : vector<8x8xf32> to vector<8x8xbf16>
    %cst_56 = arith.constant dense<0.000000e+00> : vector<8x64xf32>
    %181 = tpu.matmul %180, %5, %cst_56 {dimension_numbers = #tpu.dot_dimension_numbers<[1], [0], [0], [1], [0, 0, 1, 1], [], []>} : vector<8x8xbf16>, vector<8x64xbf16>, vector<8x64xf32> -> vector<8x64xf32>
    %182 = vector.broadcast %165 : vector<1x64xf32> to vector<8x64xf32>
    %183 = arith.mulf %181, %182 : vector<8x64xf32>
    %184 = arith.addf %163, %183 : vector<8x64xf32>
    %c7_i32 = arith.constant 7 : i32
    %185 = arith.index_cast %c7_i32 : i32 to index
    %c0_57 = arith.constant 0 : index
    %186 = vector.load %arg17[%185, %c0_57] : memref<8x64xf32, #tpu.memory_space<vmem>>, vector<1x64xf32>
    %187 = arith.truncf %186 : vector<1x64xf32> to vector<1x64xbf16>
    %188 = vector.broadcast %187 : vector<1x64xbf16> to vector<8x64xbf16>
    %189 = arith.mulf %36, %188 : vector<8x64xbf16>
    %cst_58 = arith.constant dense<0.000000e+00> : vector<8x8xf32>
    %190 = tpu.matmul %189, %3, %cst_58 {dimension_numbers = #tpu.dot_dimension_numbers<[1], [1], [0], [0], [0, 0, 1, 0], [], []>} : vector<8x64xbf16>, vector<8x64xbf16>, vector<8x8xf32> -> vector<8x8xf32>
    %cst_59 = arith.constant dense<0xFF800000> : vector<8xf32>
    %191 = vector.multi_reduction <maximumf>, %190, %cst_59 [1] : vector<8x8xf32> to vector<8xf32>
    %192 = vector.shape_cast %191 : vector<8xf32> to vector<8x1xf32>
    %193 = vector.broadcast %192 : vector<8x1xf32> to vector<8x8xf32>
    %194 = arith.subf %190, %193 : vector<8x8xf32>
    %195 = math.exp %194 : vector<8x8xf32>
    %cst_60 = arith.constant dense<0.000000e+00> : vector<8xf32>
    %196 = vector.multi_reduction <add>, %195, %cst_60 [1] : vector<8x8xf32> to vector<8xf32>
    %197 = vector.shape_cast %196 : vector<8xf32> to vector<8x1xf32>
    %198 = tpu.reciprocal %197 {approx = true} : vector<8x1xf32> -> vector<8x1xf32>
    %199 = vector.broadcast %198 : vector<8x1xf32> to vector<8x8xf32>
    %200 = arith.mulf %195, %199 : vector<8x8xf32>
    %201 = arith.truncf %200 : vector<8x8xf32> to vector<8x8xbf16>
    %cst_61 = arith.constant dense<0.000000e+00> : vector<8x64xf32>
    %202 = tpu.matmul %201, %5, %cst_61 {dimension_numbers = #tpu.dot_dimension_numbers<[1], [0], [0], [1], [0, 0, 1, 1], [], []>} : vector<8x8xbf16>, vector<8x64xbf16>, vector<8x64xf32> -> vector<8x64xf32>
    %203 = vector.broadcast %186 : vector<1x64xf32> to vector<8x64xf32>
    %204 = arith.mulf %202, %203 : vector<8x64xf32>
    %205 = arith.addf %184, %204 : vector<8x64xf32>
    %c8_i32 = arith.constant 8 : i32
    %206 = arith.truncf %205 : vector<8x64xf32> to vector<8x64xbf16>
    %c0_62 = arith.constant 0 : index
    %c0_63 = arith.constant 0 : index
    %207 = vector.load %arg9[%c0_62, %c0_63] : memref<64x64xbf16, #tpu.memory_space<vmem>>, vector<64x64xbf16>
    %cst_64 = arith.constant dense<0.000000e+00> : vector<8x64xf32>
    %208 = tpu.matmul %206, %207, %cst_64 {dimension_numbers = #tpu.dot_dimension_numbers<[1], [0], [0], [1], [0, 0, 1, 1], [], []>} : vector<8x64xbf16>, vector<64x64xbf16>, vector<8x64xf32> -> vector<8x64xf32>
    %c0_65 = arith.constant 0 : index
    %c0_66 = arith.constant 0 : index
    %209 = vector.load %arg10[%c0_65, %c0_66] : memref<1x64xf32, #tpu.memory_space<vmem>>, vector<1x64xf32>
    %210 = vector.broadcast %209 : vector<1x64xf32> to vector<8x64xf32>
    %211 = arith.addf %208, %210 : vector<8x64xf32>
    %212 = arith.addf %1, %211 : vector<8x64xf32>
    %213 = arith.truncf %212 : vector<8x64xf32> to vector<8x64xbf16>
    %cst_67 = arith.constant 0.000000e+00 : f32
    %214 = vector.broadcast %cst_67 : f32 to vector<8x64xf32>
    %c0_68 = arith.constant 0 : index
    %c0_69 = arith.constant 0 : index
    %215 = vector.load %arg11[%c0_68, %c0_69] : memref<64x256xbf16, #tpu.memory_space<vmem>>, vector<64x256xbf16>
    %cst_70 = arith.constant dense<0.000000e+00> : vector<8x256xf32>
    %216 = tpu.matmul %213, %215, %cst_70 {dimension_numbers = #tpu.dot_dimension_numbers<[1], [0], [0], [1], [0, 0, 1, 1], [], []>} : vector<8x64xbf16>, vector<64x256xbf16>, vector<8x256xf32> -> vector<8x256xf32>
    %c0_71 = arith.constant 0 : index
    %c0_72 = arith.constant 0 : index
    %217 = vector.load %arg12[%c0_71, %c0_72] : memref<1x256xf32, #tpu.memory_space<vmem>>, vector<1x256xf32>
    %218 = vector.broadcast %217 : vector<1x256xf32> to vector<8x256xf32>
    %219 = arith.addf %216, %218 : vector<8x256xf32>
    %cst_73 = arith.constant 5.000000e-01 : f32
    %220 = vector.broadcast %cst_73 : f32 to vector<8x256xf32>
    %221 = arith.mulf %220, %219 : vector<8x256xf32>
    %cst_74 = arith.constant 0.707106769 : f32
    %222 = vector.broadcast %cst_74 : f32 to vector<8x256xf32>
    %223 = arith.mulf %219, %222 : vector<8x256xf32>
    %224 = math.erf %223 : vector<8x256xf32>
    %cst_75 = arith.constant 1.000000e+00 : f32
    %225 = vector.broadcast %cst_75 : f32 to vector<8x256xf32>
    %226 = arith.addf %225, %224 : vector<8x256xf32>
    %227 = arith.mulf %221, %226 : vector<8x256xf32>
    %228 = arith.truncf %227 : vector<8x256xf32> to vector<8x256xbf16>
    %c0_76 = arith.constant 0 : index
    %c0_77 = arith.constant 0 : index
    %229 = vector.load %arg13[%c0_76, %c0_77] : memref<256x64xbf16, #tpu.memory_space<vmem>>, vector<256x64xbf16>
    %cst_78 = arith.constant dense<0.000000e+00> : vector<8x64xf32>
    %230 = tpu.matmul %228, %229, %cst_78 {dimension_numbers = #tpu.dot_dimension_numbers<[1], [0], [0], [1], [0, 0, 1, 1], [], []>} : vector<8x256xbf16>, vector<256x64xbf16>, vector<8x64xf32> -> vector<8x64xf32>
    %231 = arith.addf %214, %230 : vector<8x64xf32>
    %c0_79 = arith.constant 0 : index
    %c0_80 = arith.constant 0 : index
    %232 = vector.load %arg14[%c0_79, %c0_80] : memref<1x64xf32, #tpu.memory_space<vmem>>, vector<1x64xf32>
    %233 = vector.broadcast %232 : vector<1x64xf32> to vector<8x64xf32>
    %234 = arith.addf %231, %233 : vector<8x64xf32>
    %235 = arith.addf %212, %234 : vector<8x64xf32>
    %c0_81 = arith.constant 0 : index
    %c0_82 = arith.constant 0 : index
    %236 = vector.load %arg15[%c0_81, %c0_82] : memref<1x64xf32, #tpu.memory_space<vmem>>, vector<1x64xf32>
    %c0_83 = arith.constant 0 : index
    %c0_84 = arith.constant 0 : index
    %237 = vector.load %arg16[%c0_83, %c0_84] : memref<1x64xf32, #tpu.memory_space<vmem>>, vector<1x64xf32>
    %cst_85 = arith.constant dense<0.000000e+00> : vector<8xf32>
    %238 = vector.multi_reduction <add>, %235, %cst_85 [1] : vector<8x64xf32> to vector<8xf32>
    %239 = vector.shape_cast %238 : vector<8xf32> to vector<8x1xf32>
    %cst_86 = arith.constant 6.400000e+01 : f32
    %240 = vector.broadcast %cst_86 : f32 to vector<8x1xf32>
    %241 = arith.divf %239, %240 : vector<8x1xf32>
    %242 = vector.broadcast %241 : vector<8x1xf32> to vector<8x64xf32>
    %243 = arith.subf %235, %242 : vector<8x64xf32>
    %244 = arith.mulf %243, %243 : vector<8x64xf32>
    %cst_87 = arith.constant dense<0.000000e+00> : vector<8xf32>
    %245 = vector.multi_reduction <add>, %244, %cst_87 [1] : vector<8x64xf32> to vector<8xf32>
    %246 = vector.shape_cast %245 : vector<8xf32> to vector<8x1xf32>
    %cst_88 = arith.constant 6.400000e+01 : f32
    %247 = vector.broadcast %cst_88 : f32 to vector<8x1xf32>
    %248 = arith.divf %246, %247 : vector<8x1xf32>
    %249 = vector.broadcast %241 : vector<8x1xf32> to vector<8x64xf32>
    %250 = arith.subf %235, %249 : vector<8x64xf32>
    %cst_89 = arith.constant 9.99999974E-6 : f32
    %251 = vector.broadcast %cst_89 : f32 to vector<8x1xf32>
    %252 = arith.addf %248, %251 : vector<8x1xf32>
    %253 = math.rsqrt %252 : vector<8x1xf32>
    %254 = vector.broadcast %253 : vector<8x1xf32> to vector<8x64xf32>
    %255 = arith.mulf %250, %254 : vector<8x64xf32>
    %256 = vector.broadcast %236 : vector<1x64xf32> to vector<8x64xf32>
    %257 = arith.mulf %255, %256 : vector<8x64xf32>
    %258 = vector.broadcast %237 : vector<1x64xf32> to vector<8x64xf32>
    %259 = arith.addf %257, %258 : vector<8x64xf32>
    %c0_90 = arith.constant 0 : index
    %c0_91 = arith.constant 0 : index
    %c0_92 = arith.constant 0 : index
    %260 = vector.load %arg18[%c0_90, %c0_91, %c0_92] : memref<1x8x64xf32, #tpu.memory_space<vmem>>, vector<1x8x64xf32>
    %261 = vector.shape_cast %260 : vector<1x8x64xf32> to vector<8x64xf32>
    %262 = vector.shape_cast %259 : vector<8x64xf32> to vector<1x8x64xf32>
    tpu.vector_store %arg18[%c0_90, %c0_91, %c0_92], %262 {strides = array<i32>} : memref<1x8x64xf32, #tpu.memory_space<vmem>>, vector<1x8x64xf32>,
    return
  }
  func.func @transform_0(%arg0: i32, %arg1: i32) -> (i32, i32, i32) {
    %c0_i32 = arith.constant 0 : i32
    %c0_i32_0 = arith.constant 0 : i32
    return %arg0, %arg1, %c0_i32 : i32, i32, i32
  }
  func.func @transform_1(%arg0: i32, %arg1: i32) -> (i32, i32, i32) {
    %c0_i32 = arith.constant 0 : i32
    %c0_i32_0 = arith.constant 0 : i32
    %c0_i32_1 = arith.constant 0 : i32
    return %arg0, %c0_i32, %c0_i32_0 : i32, i32, i32
  }
  func.func @transform_2(%arg0: i32, %arg1: i32) -> (i32, i32, i32) {
    %c0_i32 = arith.constant 0 : i32
    %c0_i32_0 = arith.constant 0 : i32
    %c0_i32_1 = arith.constant 0 : i32
    return %arg0, %c0_i32, %c0_i32_0 : i32, i32, i32
  }
  func.func @transform_3(%arg0: i32, %arg1: i32) -> (i32, i32) {
    %c0_i32 = arith.constant 0 : i32
    %c0_i32_0 = arith.constant 0 : i32
    %c0_i32_1 = arith.constant 0 : i32
    return %c0_i32, %c0_i32_0 : i32, i32
  }
  func.func @transform_4(%arg0: i32, %arg1: i32) -> (i32, i32) {
    %c0_i32 = arith.constant 0 : i32
    %c0_i32_0 = arith.constant 0 : i32
    %c0_i32_1 = arith.constant 0 : i32
    return %c0_i32, %c0_i32_0 : i32, i32
  }
  func.func @transform_5(%arg0: i32, %arg1: i32) -> (i32, i32) {
    %c0_i32 = arith.constant 0 : i32
    %c0_i32_0 = arith.constant 0 : i32
    %c0_i32_1 = arith.constant 0 : i32
    return %c0_i32, %c0_i32_0 : i32, i32
  }
  func.func @transform_6(%arg0: i32, %arg1: i32) -> (i32, i32) {
    %c0_i32 = arith.constant 0 : i32
    %c0_i32_0 = arith.constant 0 : i32
    %c0_i32_1 = arith.constant 0 : i32
    return %c0_i32, %c0_i32_0 : i32, i32
  }
  func.func @transform_7(%arg0: i32, %arg1: i32) -> (i32, i32) {
    %c0_i32 = arith.constant 0 : i32
    %c0_i32_0 = arith.constant 0 : i32
    %c0_i32_1 = arith.constant 0 : i32
    return %c0_i32, %c0_i32_0 : i32, i32
  }
  func.func @transform_8(%arg0: i32, %arg1: i32) -> (i32, i32) {
    %c0_i32 = arith.constant 0 : i32
    %c0_i32_0 = arith.constant 0 : i32
    %c0_i32_1 = arith.constant 0 : i32
    return %c0_i32, %c0_i32_0 : i32, i32
  }
  func.func @transform_9(%arg0: i32, %arg1: i32) -> (i32, i32) {
    %c0_i32 = arith.constant 0 : i32
    %c0_i32_0 = arith.constant 0 : i32
    %c0_i32_1 = arith.constant 0 : i32
    return %c0_i32, %c0_i32_0 : i32, i32
  }
  func.func @transform_10(%arg0: i32, %arg1: i32) -> (i32, i32) {
    %c0_i32 = arith.constant 0 : i32
    %c0_i32_0 = arith.constant 0 : i32
    %c0_i32_1 = arith.constant 0 : i32
    return %c0_i32, %c0_i32_0 : i32, i32
  }
  func.func @transform_11(%arg0: i32, %arg1: i32) -> (i32, i32) {
    %c0_i32 = arith.constant 0 : i32
    %c0_i32_0 = arith.constant 0 : i32
    %c0_i32_1 = arith.constant 0 : i32
    return %c0_i32, %c0_i32_0 : i32, i32
  }
  func.func @transform_12(%arg0: i32, %arg1: i32) -> (i32, i32) {
    %c0_i32 = arith.constant 0 : i32
    %c0_i32_0 = arith.constant 0 : i32
    %c0_i32_1 = arith.constant 0 : i32
    return %c0_i32, %c0_i32_0 : i32, i32
  }
  func.func @transform_13(%arg0: i32, %arg1: i32) -> (i32, i32) {
    %c0_i32 = arith.constant 0 : i32
    %c0_i32_0 = arith.constant 0 : i32
    %c0_i32_1 = arith.constant 0 : i32
    return %c0_i32, %c0_i32_0 : i32, i32
  }
  func.func @transform_14(%arg0: i32, %arg1: i32) -> (i32, i32) {
    %c0_i32 = arith.constant 0 : i32
    %c0_i32_0 = arith.constant 0 : i32
    %c0_i32_1 = arith.constant 0 : i32
    return %c0_i32, %c0_i32_0 : i32, i32
  }
  func.func @transform_15(%arg0: i32, %arg1: i32) -> (i32, i32) {
    %c0_i32 = arith.constant 0 : i32
    %c0_i32_0 = arith.constant 0 : i32
    %c0_i32_1 = arith.constant 0 : i32
    return %c0_i32, %c0_i32_0 : i32, i32
  }
  func.func @transform_16(%arg0: i32, %arg1: i32) -> (i32, i32, i32) {
    %c0_i32 = arith.constant 0 : i32
    %c0_i32_0 = arith.constant 0 : i32
    return %arg0, %arg1, %c0_i32 : i32, i32, i32
  }
}

</mosaic_0001>

<bundles_post_ra>
// kernel: altered_residual_block.1
= control target key start
LH: loop header
LB: loop body
LE: loop exit
PB: predicated region body
PF: predicated region fallthrough
CT: control target
= control target key end

     0   :  { %s2594_s21 = smov 0   ;;  %s2596_s22 = smov 0   ;;  %s2986_s0 = inlined_call_operand.vmem [shape: f32[2,8,64], index: 0, kind: input, shape index: {}]   ;;  %s2987_s1 = inlined_call_operand.vmem [shape: bf16[2,8,64], index: 1, kind: input, shape index: {}]   ;;  %s2988_s2 = inlined_call_operand.vmem [shape: bf16[2,8,64], index: 2, kind: input, shape index: {}]   ;;  %s2989_s3 = inlined_call_operand.vmem [shape: f32[1,64], index: 3, kind: input, shape index: {}]   ;;  %s2990_s4 = inlined_call_operand.vmem [shape: f32[1,64], index: 4, kind: input, shape index: {}]   ;;  %s2991_s5 = inlined_call_operand.vmem [shape: bf16[64,64], index: 5, kind: input, shape index: {}]   ;;  %s2992_s6 = inlined_call_operand.vmem [shape: f32[1,64], index: 6, kind: input, shape index: {}]   ;;  %s2993_s7 = inlined_call_operand.vmem [shape: bf16[64,64], index: 7, kind: input, shape index: {}]   ;;  %s2994_s8 = inlined_call_operand.vmem [shape: f32[1,64], index: 8, kind: input, shape index: {}]   ;;  %s2995_s9 = inlined_call_operand.vmem [shape: bf16[64,256], index: 9, kind: input, shape index: {}]   ;;  %s2996_s10 = inlined_call_operand.vmem [shape: f32[1,256], index: 10, kind: input, shape index: {}]   ;;  %s2997_s11 = inlined_call_operand.vmem [shape: bf16[256,64], index: 11, kind: input, shape index: {}]   ;;  %s2998_s12 = inlined_call_operand.vmem [shape: f32[1,64], index: 12, kind: input, shape index: {}]   ;;  %s2999_s13 = inlined_call_operand.vmem [shape: f32[1,64], index: 13, kind: input, shape index: {}]   ;;  %s3000_s14 = inlined_call_operand.vmem [shape: f32[1,64], index: 14, kind: input, shape index: {}]   ;;  %s3001_s15 = inlined_call_operand.vmem [shape: f32[8,64], index: 15, kind: input, shape index: {}]   ;;  %s3002_s16 = inlined_call_operand.vmem [shape: f32[2,8,64], index: 16, kind: output, shape index: {}]  }
   0x1   :  { %3003 = sst [smem:[#allocation2_spill]] %s2986_s0  ;;  %s2598_s23 = smov 0  }
   0x2 LB: > { %s38_s24 = sadd.s32 1, %s2500_s22  ;;  %p2130_p0 = scmp.ge.s32.totalorder %s2504_s23, 1  ;;  %s2504_s23 = sphi %s2598_s23, %s26_s23   ;;  %s2500_s22 = sphi %s2596_s22, %s3006_s22   ;;  %s2496_s21 = sphi %s2594_s21, %s3005_s21  }
   0x3   : > { %p40_p1 = scmp.ge.s32.totalorder %s38_s24, 2  ;;  %p498_p2 = scmp.lt.s32.totalorder %s2504_s23, 3 }
   0x5   : > { %s3008_s24 = smov (%p40_p1, %s38_s24), 0  ;;  %p499_p3 = pnand %p2130_p0, %p498_p2 }
   0x6   : > { %p560_p4 = scmp.lt.s32.totalorder (!%p499_p3), %s2496_s21, 1  ;;  %vm588_vm0 = vcmask (!%p499_p3), 523264   ;;  %s3004_s28 = sld [smem:[#allocation2_spill]] (!%p499_p3)  ;;  %v2406_v9 = vld [vmem:[%s2991_s5] sm:$0xff] (!%p499_p3)   ;;  %v2506_v10 = vmov (!%p499_p3), 0.0   ;;  %vm2507_vm1 = vmmov (!%p499_p3), 0   ;;  %v706_v24 = vlaneseq (!%p499_p3) }
   0x7   : > { %502 = sbr.rel (%p499_p3) target bundleno = 2339 (0x923), region = 84  ;;  %2259 = vmatprep.subr.bf16.mxu1 (!%p499_p3), %v2506_v10  ;;  %2267 = vmatprep.mubr.msk.bf16.mxu1 (!%p499_p3), %vm2507_vm1, %v2506_v10  ;;  %v2407_v11 = vld [vmem:[%s2991_s5 + $0x8] sm:$0xff] (!%p499_p3)   ;;  %v2408_v12 = vld [vmem:[%s2991_s5 + $0x10] sm:$0xff] (!%p499_p3)   ;;  %v2409_v13 = vld [vmem:[%s2991_s5 + $0x18] sm:$0xff] (!%p499_p3)   ;;  %vm773_vm2 = vcmask (!%p499_p3), 1043456   ;;  %vm757_vm3 = vcmask (!%p499_p3), 64512  }
   0x8   : > { %2260 = vmatpush3.bf16.msra.mxu1 (!%p499_p3), %v2406_v9  ;;  %2283 = vmatprep.subr.bf16.mxu0 (!%p499_p3), %v2506_v10  ;;  %v2135_v18 = vld [vmem:[%s2989_s3] ss:$0 sm:$0xff] (!%p499_p3)  ;;  %v2678_v26 = vld [vmem:[%s3001_s15 + $0x1] sm:$0x1] (!%p499_p3)  ;;  %v2682_v28 = vshrl.u32 (!%p499_p3), %v706_v24, 7 }
   0x9   : > { %2261 = vmatprep.subr.bf16.mxu1 (!%p499_p3), %v2506_v10  ;;  %2285 = vmatprep.mubr.msk.bf16.mxu0 (!%p499_p3), %vm2507_vm1, %v2506_v10  ;;  %v2136_v20 = vld [vmem:[%s2990_s4] ss:$0 sm:$0xff] (!%p499_p3)  ;;  %v824_v29 = vpack.c.bf16 (!%p499_p3), %v2678_v26, %v2678_v26  ;;  %v2695_v34 = vld [vmem:[%s3001_s15 + $0x2] sm:$0x1] (!%p499_p3)  ;;  %v2711_v49 = vld [vmem:[%s3001_s15 + $0x3] sm:$0x1] (!%p499_p3) }
   0xa   : > { %v2673_v25 = vld [vmem:[%s3001_s15] sm:$0x1] (!%p499_p3)  ;;  %v2687_v31 = vsub.s32 (!%p499_p3), 0, %v2682_v28  ;;  %v938_v40 = vpack.c.bf16 (!%p499_p3), %v2695_v34, %v2695_v34  ;;  %v1052_v51 = vpack.c.bf16 (!%p499_p3), %v2711_v49, %v2711_v49  ;;  %v2729_v54 = vld [vmem:[%s3001_s15 + $0x4] sm:$0x1] (!%p499_p3) }
   0xb   : > { %v702_v27 = vpack.c.bf16 (!%p499_p3), %v2673_v25, %v2673_v25  ;;  %v826_v32 = vpack.i.b16 (!%p499_p3), %v824_v29, %v824_v29  ;;  %v2137_v33 = vld [vmem:[%s2992_s6] ss:$0 sm:$0xff] (!%p499_p3)  ;;  %v1166_v56 = vpack.c.bf16 (!%p499_p3), %v2729_v54, %v2729_v54  ;;  %v2742_v59 = vld [vmem:[%s3001_s15 + $0x5] sm:$0x1] (!%p499_p3) }
   0xc   : > { %2262 = vmatpush3.bf16.msra.mxu1 (!%p499_p3), %v2407_v11  ;;  %v940_v47 = vpack.i.b16 (!%p499_p3), %v938_v40, %v938_v40  ;;  %v1054_v53 = vpack.i.b16 (!%p499_p3), %v1052_v51, %v1052_v51  ;;  %v1280_v61 = vpack.c.bf16 (!%p499_p3), %v2742_v59, %v2742_v59 }
   0xd   : > { %2263 = vmatprep.subr.bf16.mxu1 (!%p499_p3), %v2506_v10  ;;  %v704_v30 = vpack.i.b16 (!%p499_p3), %v702_v27, %v702_v27  ;;  %v831_v39 = vrot.slane (!%p499_p3), %v826_v32, %v2687_v31  ;;  %v1168_v58 = vpack.i.b16 (!%p499_p3), %v1166_v56, %v1166_v56 }
   0xe   : > { %s3010_s21 = smov (!%p560_p4, %s2496_s21), 1  ;;  %v945_v50 = vrot.slane %v940_v47, %v2687_v31  ;;  %v1059_v55 = vrot.slane %v1054_v53, %v2687_v31  ;;  %v1282_v63 = vpack.i.b16 %v1280_v61, %v1280_v61 }
   0xf   : > { %s2131_s25 = sshll.u32 %s3010_s21, 3  ;;  %s2132_s30 = sshll.u32 %s3010_s21, 2  ;;  %v709_v38 = vrot.slane %v704_v30, %v2687_v31  ;;  %v1173_v60 = vrot.slane %v1168_v58, %v2687_v31 }
  0x10   : > { %s566_s29 = scalar_lea.vmem %s3004_s28, %s2131_s25  ;;  %s570_s18 = scalar_lea.vmem %s2987_s1, %s2132_s30  ;;  %2264 = vmatpush3.bf16.msra.mxu1 %v2408_v12 }
  0x11   : > { %v2620_v0 = vld [vmem:[%s566_s29] sm:$0xff]  ;;  %2265 = vmatprep.subr.bf16.mxu1 %v2506_v10  ;;  %s574_s28 = scalar_lea.vmem %s2988_s2, %s2132_s30  ;;  %s581_s27 = scalar_lea.vmem %s3002_s16, %s2131_s25 }
  0x12   : > { %v589_v1 = vsel %vm588_vm0, %v2620_v0, 0.0  ;;  %v584_v7 = vld [vmem:[%s570_s18] sm:$0xf] }
  0x13   : > { %590 = vadd.xlane.f32.xlu0 %v589_v1  ;;  %v2633_v8 = vsel %vm588_vm0, %v584_v7, 0  ;;  %v585_v42 = vld [vmem:[%s574_s28] sm:$0xf]  ;;  %v2755_v1 = vld [vmem:[%s3001_s15 + $0x6] sm:$0x1] }
  0x14   : > { %2284 = vmatpush3.bf16.xpose.msra.mxu0 %v2633_v8  ;;  %2266 = vmatpush3.bf16.msra.mxu1 %v2409_v13  ;;  %v2706_v48 = vsel %vm773_vm2, %v585_v42, 0 }
  0x15   : > { %2295 = vmatprep.subr.bf16.mxu0 %v2506_v10  ;;  %2271 = vmatprep.subr.bf16.mxu1 %v2506_v10 }
  0xa0   : > { %v591_v2 = vpop.xlane.xlu0 %590 }
  0xa1   : > { %v593_v3 = vmul.f32 0.015625, %v591_v2  ;;  %v1287_v2 = vrot.slane %v1282_v63, %v2687_v31 }
  0xa3   : > { %v594_v4 = vsub.f32 %v2620_v0, %v593_v3  ;;  %v1394_v3 = vpack.c.bf16 %v2755_v1, %v2755_v1 }
  0xa5   : > { %v595_v5 = vmul.f32 %v594_v4, %v594_v4 }
  0xa7   : > { %v596_v6 = vsel %vm588_vm0, %v595_v5, 0.0  ;;  %v1396_v5 = vpack.i.b16 %v1394_v3, %v1394_v3 }
  0xa8   : > { %597 = vadd.xlane.f32.xlu0 %v596_v6  ;;  %v2768_v6 = vld [vmem:[%s3001_s15 + $0x7] sm:$0x1] }
  0xa9   : > { %v1401_v7 = vrot.slane %v1396_v5, %v2687_v31  ;;  %v1508_v9 = vpack.c.bf16 %v2768_v6, %v2768_v6 }
  0xab   : > { %v1510_v12 = vpack.i.b16 %v1508_v9, %v1508_v9 }
  0xad   : > { %v1515_v13 = vrot.slane %v1510_v12, %v2687_v31 }
 0x135   : > { %v598_v14 = vpop.xlane.xlu0 %597 }
 0x136   : > { %v599_v15 = vmul.f32 0.015625, %v598_v14 }
 0x138   : > { %v600_v16 = vadd.f32 1e-05, %v599_v15 }
 0x13a   : > { %2442 = vrsqrt.f32 %v600_v16 }
 0x144   : > { %v2443_v17 = vpop.eup %2442 }
 0x145   : > { %v602_v19 = vmul.f32 %v2443_v17, %v594_v4 }
 0x147   : > { %v609_v21 = vmul.f32 %v2135_v18, %v602_v19 }
 0x149   : > { %v616_v22 = vadd.f32 %v2136_v20, %v609_v21 }
 0x14b   : > { %v617_v23 = vpack.c.bf16 %v616_v22, %v616_v22 }
 0x14d   : > { %2268 = vmatmul.mubr.msk.bf16.vlgmr.msra.gmra.mrb[0].mxu1 %vm588_vm0, %v617_v23 }
 0x14e   : > { %2272 = vmatpush3.bf16.xpose.msra.mxu1 %v2633_v8  ;;  %2273 = vmatprep.mubr.msk.bf16.mxu1 %vm2507_vm1, %v2506_v10 }
 0x14f   : > { %2277 = vmatprep.subr.bf16.mxu1 %v2506_v10 }
 0x220   : > { %v694_v35 = vpop.f32.mrb[0].mxu1 }
 0x221   : > { %v695_v36 = vadd.f32 %v2137_v33, %v694_v35  ;;  %v2269_v37 = vpop.f32.mrb[1].mxu1 }
 0x222   : > { %v697_v41 = vpop.f32.mrb[2].mxu1 }
 0x223   : > { %v700_v43 = vpack.c.bf16 %v695_v36, %v695_v36  ;;  %v2270_v44 = vpop.f32.mrb[3].mxu1 }
 0x225   : > { %v710_v45 = vmul.bf16 %v709_v38, %v700_v43  ;;  %v832_v46 = vmul.bf16 %v831_v39, %v700_v43  ;;  %v946_v52 = vmul.bf16 %v945_v50, %v700_v43  ;;  %v1060_v57 = vmul.bf16 %v1059_v55, %v700_v43 }
 0x226   : > { %v1174_v62 = vmul.bf16 %v1173_v60, %v700_v43  ;;  %v1288_v4 = vmul.bf16 %v1287_v2, %v700_v43  ;;  %v1402_v11 = vmul.bf16 %v1401_v7, %v700_v43  ;;  %v1516_v14 = vmul.bf16 %v1515_v13, %v700_v43 }
 0x227   : > { %2274 = vmatmul.mubr.msk.bf16.vlgmr.msra.gmra.mrb[4].mxu1 %vm588_vm0, %v710_v45  ;;  %2286 = vmatmul.mubr.msk.bf16.vlgmr.msra.gmra.mrb[0].mxu0 %vm588_vm0, %v832_v46 }
 0x228   : > { %2296 = vmatpush3.bf16.xpose.msra.mxu0 %v2633_v8  ;;  %2297 = vmatprep.mubr.msk.bf16.mxu0 %vm2507_vm1, %v2506_v10 }
 0x229   : > { %2307 = vmatprep.subr.bf16.mxu0 %v2506_v10  ;;  %2278 = vmatpush3.bf16.msra.mxu1 %v2706_v48 }
 0x22a   : > { %2279 = vmatprep.mubr.msk.bf16.mxu1 %vm2507_vm1, %v2506_v10  ;;  %2289 = vmatprep.subr.bf16.mxu1 %v2506_v10 }
 0x22f   : > { %2298 = vmatmul.mubr.msk.bf16.vlgmr.msra.gmra.mrb[4].mxu0 %vm588_vm0, %v946_v52 }
 0x230   : > { %2308 = vmatpush3.bf16.xpose.msra.mxu0 %v2633_v8  ;;  %2309 = vmatprep.mubr.msk.bf16.mxu0 %vm2507_vm1, %v2506_v10 }
 0x231   : > { %2319 = vmatprep.subr.bf16.mxu0 %v2506_v10 }
 0x237   : > { %2310 = vmatmul.mubr.msk.bf16.vlgmr.msra.gmra.mrb[8].mxu0 %vm588_vm0, %v1060_v57 }
 0x238   : > { %2320 = vmatpush3.bf16.xpose.msra.mxu0 %v2633_v8  ;;  %2321 = vmatprep.mubr.msk.bf16.mxu0 %vm2507_vm1, %v2506_v10 }
 0x239   : > { %2331 = vmatprep.subr.bf16.mxu0 %v2506_v10 }
 0x23f   : > { %2322 = vmatmul.mubr.msk.bf16.vlgmr.msra.gmra.mrb[12].mxu0 %vm588_vm0, %v1174_v62 }
 0x240   : > { %2332 = vmatpush3.bf16.xpose.msra.mxu0 %v2633_v8  ;;  %2333 = vmatprep.mubr.msk.bf16.mxu0 %vm2507_vm1, %v2506_v10 }
 0x241   : > { %2343 = vmatprep.subr.bf16.mxu0 %v2506_v10 }
 0x247   : > { %2334 = vmatmul.mubr.msk.bf16.vlgmr.msra.gmra.mrb[16].mxu0 %vm588_vm0, %v1288_v4 }
 0x248   : > { %2344 = vmatpush3.bf16.xpose.msra.mxu0 %v2633_v8  ;;  %2345 = vmatprep.mubr.msk.bf16.mxu0 %vm2507_vm1, %v2506_v10 }
 0x249   : > { %2355 = vmatprep.subr.bf16.mxu0 %v2506_v10 }
 0x24f   : > { %2346 = vmatmul.mubr.msk.bf16.vlgmr.msra.gmra.mrb[20].mxu0 %vm588_vm0, %v1402_v11 }
 0x250   : > { %2356 = vmatpush3.bf16.xpose.msra.mxu0 %v2633_v8  ;;  %2357 = vmatprep.mubr.msk.bf16.mxu0 %vm2507_vm1, %v2506_v10 }
 0x251   : > { %2367 = vmatprep.subr.bf16.mxu0 %v2506_v10 }
 0x257   : > { %2358 = vmatmul.mubr.msk.bf16.vlgmr.msra.gmra.mrb[24].mxu0 %vm588_vm0, %v1516_v14 }
 0x258   : > { %2375 = vmatprep.mubr.msk.bf16.mxu0 %vm2507_vm1, %v2506_v10 }
 0x2fa   : > { %v751_v15 = vpop.f32.mrb[4].mxu1  ;;  %v870_v16 = vpop.f32.mrb[0].mxu0 }
 0x2fb   : > { %v2275_v17 = vpop.f32.mrb[5].mxu1  ;;  %v2287_v18 = vpop.f32.mrb[1].mxu0  ;;  %v758_v8 = vsel %vm757_vm3, %v751_v15, -inf  ;;  %v876_v23 = vsel %vm757_vm3, %v870_v16, -inf }
 0x2fc   : > { %v873_v19 = vpop.f32.mrb[2].mxu0  ;;  %759 = vmax.xlane.f32.xlu1 %v758_v8  ;;  %v754_v20 = vpop.f32.mrb[6].mxu1 }
 0x2fd   : > { %v2276_v21 = vpop.f32.mrb[7].mxu1  ;;  %v2288_v22 = vpop.f32.mrb[3].mxu0 }
 0x300   : > { %877 = vmax.xlane.f32.xlu1 %v876_v23 }
 0x302   : > { %v984_v24 = vpop.f32.mrb[4].mxu0 }
 0x303   : > { %v2299_v27 = vpop.f32.mrb[5].mxu0  ;;  %v990_v29 = vsel %vm757_vm3, %v984_v24, -inf }
 0x304   : > { %991 = vmax.xlane.f32.xlu0 %v990_v29  ;;  %v987_v30 = vpop.f32.mrb[6].mxu0 }
 0x305   : > { %v2300_v32 = vpop.f32.mrb[7].mxu0 }
 0x30a   : > { %v1098_v33 = vpop.f32.mrb[8].mxu0 }
 0x30b   : > { %v2311_v35 = vpop.f32.mrb[9].mxu0  ;;  %v1104_v36 = vsel %vm757_vm3, %v1098_v33, -inf }
 0x30c   : > { %v1101_v37 = vpop.f32.mrb[10].mxu0  ;;  %1105 = vmax.xlane.f32.xlu1 %v1104_v36 }
 0x30d   : > { %v2312_v38 = vpop.f32.mrb[11].mxu0 }
 0x312   : > { %v1212_v39 = vpop.f32.mrb[12].mxu0 }
 0x313   : > { %v2323_v40 = vpop.f32.mrb[13].mxu0  ;;  %v1218_v41 = vsel %vm757_vm3, %v1212_v39, -inf }
 0x314   : > { %1219 = vmax.xlane.f32.xlu0 %v1218_v41  ;;  %v1215_v42 = vpop.f32.mrb[14].mxu0 }
 0x315   : > { %v2324_v43 = vpop.f32.mrb[15].mxu0 }
 0x31a   : > { %v1326_v44 = vpop.f32.mrb[16].mxu0 }
 0x31b   : > { %v2335_v45 = vpop.f32.mrb[17].mxu0  ;;  %v1332_v46 = vsel %vm757_vm3, %v1326_v44, -inf }
 0x31c   : > { %v1329_v47 = vpop.f32.mrb[18].mxu0  ;;  %1333 = vmax.xlane.f32.xlu1 %v1332_v46 }
 0x31d   : > { %v2336_v50 = vpop.f32.mrb[19].mxu0 }
 0x322   : > { %v1440_v51 = vpop.f32.mrb[20].mxu0 }
 0x323   : > { %v2347_v52 = vpop.f32.mrb[21].mxu0  ;;  %v1446_v53 = vsel %vm757_vm3, %v1440_v51, -inf }
 0x324   : > { %1447 = vmax.xlane.f32.xlu0 %v1446_v53  ;;  %v1443_v55 = vpop.f32.mrb[22].mxu0 }
 0x325   : > { %v2348_v56 = vpop.f32.mrb[23].mxu0 }
 0x32a   : > { %v1554_v57 = vpop.f32.mrb[24].mxu0 }
 0x32b   : > { %v2359_v58 = vpop.f32.mrb[25].mxu0  ;;  %v1560_v60 = vsel %vm757_vm3, %v1554_v57, -inf }
 0x32c   : > { %v1557_v61 = vpop.f32.mrb[26].mxu0  ;;  %1561 = vmax.xlane.f32.xlu1 %v1560_v60 }
 0x32d   : > { %v2360_v62 = vpop.f32.mrb[27].mxu0 }
 0x389   : > { %v760_v63 = vpop.xlane.xlu1 %759 }
 0x38a   : > { %v761_v2 = vsub.f32 %v751_v15, %v760_v63 }
 0x38c   : > { %v762_v3 = vmul.f32 1.442695, %v761_v2 }
 0x38d   : > { %v878_v4 = vpop.xlane.xlu1 %877 }
 0x38e   : > { %2444 = vpow2.f32 %v762_v3  ;;  %v879_v5 = vsub.f32 %v870_v16, %v878_v4 }
 0x390   : > { %v880_v7 = vmul.f32 1.442695, %v879_v5 }
 0x391   : > { %v992_v9 = vpop.xlane.xlu0 %991 }
 0x392   : > { %2446 = vpow2.f32 %v880_v7  ;;  %v993_v11 = vsub.f32 %v984_v24, %v992_v9 }
 0x394   : > { %v994_v12 = vmul.f32 1.442695, %v993_v11 }
 0x396   : > { %2448 = vpow2.f32 %v994_v12 }
 0x398   : > { %v2445_v13 = vpop.eup %2444 }
 0x399   : > { %v1106_v14 = vpop.xlane.xlu1 %1105  ;;  %v764_v17 = vsel %vm757_vm3, %v2445_v13, 0.0 }
 0x39a   : > { %v1107_v18 = vsub.f32 %v1098_v33, %v1106_v14  ;;  %765 = vadd.xlane.f32.xlu0 %v764_v17 }
 0x39c   : > { %v2447_v8 = vpop.eup %2446  ;;  %v1108_v19 = vmul.f32 1.442695, %v1107_v18 }
 0x39d   : > { %v882_v15 = vsel %vm757_vm3, %v2447_v8, 0.0 }
 0x39e   : > { %2450 = vpow2.f32 %v1108_v19  ;;  %883 = vadd.xlane.f32.xlu1 %v882_v15 }
 0x3a0   : > { %v2449_v20 = vpop.eup %2448 }
 0x3a1   : > { %v1220_v16 = vpop.xlane.xlu0 %1219  ;;  %v996_v21 = vsel %vm757_vm3, %v2449_v20, 0.0 }
 0x3a2   : > { %v1221_v22 = vsub.f32 %v1212_v39, %v1220_v16  ;;  %997 = vadd.xlane.f32.xlu0 %v996_v21 }
 0x3a4   : > { %v1222_v23 = vmul.f32 1.442695, %v1221_v22 }
 0x3a6   : > { %2452 = vpow2.f32 %v1222_v23 }
 0x3a8   : > { %v2451_v24 = vpop.eup %2450 }
 0x3a9   : > { %v1334_v27 = vpop.xlane.xlu1 %1333  ;;  %v1110_v29 = vsel %vm757_vm3, %v2451_v24, 0.0 }
 0x3aa   : > { %v1335_v30 = vsub.f32 %v1326_v44, %v1334_v27  ;;  %1111 = vadd.xlane.f32.xlu1 %v1110_v29  ;;  %v2411_v27 = vld [vmem:[%s2993_s7 + $0x8] sm:$0xff]   ;;  %v2413_v29 = vld [vmem:[%s2993_s7 + $0x18] sm:$0xff]  }
 0x3ac   : > { %v1336_v32 = vmul.f32 1.442695, %v1335_v30  ;;  %v2414_v30 = vld [vmem:[%s2995_s9] ss:$8 sps:$4 sm:$0xff]  }
 0x3ae   : > { %2454 = vpow2.f32 %v1336_v32  ;;  %v2416_v32 = vld [vmem:[%s2995_s9 + $0x4] ss:$8 sps:$4 sm:$0xff]  }
 0x3b0   : > { %v2453_v33 = vpop.eup %2452 }
 0x3b1   : > { %v1448_v35 = vpop.xlane.xlu0 %1447  ;;  %v1224_v36 = vsel %vm757_vm3, %v2453_v33, 0.0 }
 0x3b2   : > { %v1449_v37 = vsub.f32 %v1440_v51, %v1448_v35  ;;  %1225 = vadd.xlane.f32.xlu0 %v1224_v36  ;;  %v2422_v35 = vld [vmem:[%s2995_s9 + $0x24] ss:$8 sps:$4 sm:$0xff]   ;;  %v2420_v36 = vld [vmem:[%s2995_s9 + $0x20] ss:$8 sps:$4 sm:$0xff]  }
 0x3b4   : > { %v1450_v38 = vmul.f32 1.442695, %v1449_v37 }
 0x3b6   : > { %2456 = vpow2.f32 %v1450_v38 }
 0x3b8   : > { %v2455_v39 = vpop.eup %2454 }
 0x3b9   : > { %v1562_v40 = vpop.xlane.xlu1 %1561  ;;  %v1338_v41 = vsel %vm757_vm3, %v2455_v39, 0.0 }
 0x3ba   : > { %v1563_v42 = vsub.f32 %v1554_v57, %v1562_v40  ;;  %1339 = vadd.xlane.f32.xlu1 %v1338_v41  ;;  %v820_v41 = vrot.slane %v2673_v25, %v2687_v31  ;;  %v1162_v25 = vrot.slane %v2711_v49, %v2687_v31 }
 0x3bc   : > { %v1564_v43 = vmul.f32 1.442695, %v1563_v42  ;;  %v934_v42 = vrot.slane %v2678_v26, %v2687_v31 }
 0x3be   : > { %2458 = vpow2.f32 %v1564_v43 }
 0x3c0   : > { %v2801_v44 = vpop.eup %2456 }
 0x3c1   : > { %v1452_v45 = vsel %vm757_vm3, %v2801_v44, 0.0 }
 0x3c2   : > { %1453 = vadd.xlane.f32.xlu0 %v1452_v45 }
 0x3c8   : > { %v2805_v46 = vpop.eup %2458 }
 0x3c9   : > { %v1566_v47 = vsel %vm757_vm3, %v2805_v46, 0.0 }
 0x3ca   : > { %1567 = vadd.xlane.f32.xlu1 %v1566_v47 }
 0x427   : > { %v766_v50 = vpop.xlane.xlu0 %765 }
 0x428   : > { %2460 = vrcp.f32 %v766_v50 }
 0x42b   : > { %v884_v51 = vpop.xlane.xlu1 %883 }
 0x42c   : > { %2462 = vrcp.f32 %v884_v51 }
 0x42f   : > { %v998_v52 = vpop.xlane.xlu0 %997 }
 0x430   : > { %2464 = vrcp.f32 %v998_v52  ;;  %v1048_v52 = vrot.slane %v2695_v34, %v2687_v31 }
 0x432   : > { %v2461_v53 = vpop.eup %2460 }
 0x433   : > { %v768_v55 = vmul.f32 %v2461_v53, %v2445_v13 }
 0x435   : > { %v769_v56 = vpack.c.bf16 %v768_v55, %v768_v55 }
 0x436   : > { %v2463_v57 = vpop.eup %2462 }
 0x437   : > { %2280 = vmatmul.mubr.msk.bf16.vlgmr.msra.gmra.mrb[8].mxu1 %vm757_vm3, %v769_v56  ;;  %v886_v58 = vmul.f32 %v2463_v57, %v2447_v8  ;;  %v1112_v60 = vpop.xlane.xlu1 %1111 }
 0x438   : > { %2290 = vmatpush3.bf16.msra.mxu1 %v2706_v48  ;;  %2291 = vmatprep.mubr.msk.bf16.mxu1 %vm2507_vm1, %v2506_v10  ;;  %2466 = vrcp.f32 %v1112_v60 }
 0x439   : > { %2301 = vmatprep.subr.bf16.mxu1 %v2506_v10  ;;  %v887_v61 = vpack.c.bf16 %v886_v58, %v886_v58 }
 0x43a   : > { %v2465_v62 = vpop.eup %2464 }
 0x43b   : > { %v1000_v63 = vmul.f32 %v2465_v62, %v2449_v20 }
 0x43d   : > { %v1001_v3 = vpack.c.bf16 %v1000_v63, %v1000_v63 }
 0x43f   : > { %2292 = vmatmul.mubr.msk.bf16.vlgmr.msra.gmra.mrb[12].mxu1 %vm757_vm3, %v887_v61  ;;  %v1226_v2 = vpop.xlane.xlu0 %1225 }
 0x440   : > { %2302 = vmatpush3.bf16.msra.mxu1 %v2706_v48  ;;  %2303 = vmatprep.mubr.msk.bf16.mxu1 %vm2507_vm1, %v2506_v10  ;;  %2468 = vrcp.f32 %v1226_v2 }
 0x441   : > { %2313 = vmatprep.subr.bf16.mxu1 %v2506_v10 }
 0x442   : > { %v2467_v4 = vpop.eup %2466 }
 0x443   : > { %v1114_v5 = vmul.f32 %v2467_v4, %v2451_v24  ;;  %v2410_v24 = vld [vmem:[%s2993_s7] sm:$0xff]   ;;  %v1276_v4 = vrot.slane %v2729_v54, %v2687_v31 }
 0x444   : > { %2368 = vmatpush3.bf16.msra.mxu0 %v2410_v24  ;;  %v1618_v24 = vrot.slane %v2768_v6, %v2687_v31  ;;  %v2508_v6 = vmov 0  }
 0x445   : > { %v1115_v9 = vpack.c.bf16 %v1114_v5, %v1114_v5  ;;  %2369 = vmatprep.subr.bf16.mxu0 %v2506_v10 }
 0x447   : > { %2304 = vmatmul.mubr.msk.bf16.vlgmr.msra.gmra.mrb[16].mxu1 %vm757_vm3, %v1001_v3  ;;  %v1340_v7 = vpop.xlane.xlu1 %1339 }
 0x448   : > { %2314 = vmatpush3.bf16.msra.mxu1 %v2706_v48  ;;  %2315 = vmatprep.mubr.msk.bf16.mxu1 %vm2507_vm1, %v2506_v10  ;;  %2470 = vrcp.f32 %v1340_v7 }
 0x449   : > { %2325 = vmatprep.subr.bf16.mxu1 %v2506_v10  ;;  %2370 = vmatpush3.bf16.msra.mxu0 %v2411_v27 }
 0x44a   : > { %v2469_v11 = vpop.eup %2468  ;;  %2371 = vmatprep.subr.bf16.mxu0 %v2506_v10 }
 0x44b   : > { %v1228_v12 = vmul.f32 %v2469_v11, %v2453_v33  ;;  %v2419_v33 = vld [vmem:[%s2995_s9 + $0x14] ss:$8 sps:$4 sm:$0xff]  }
 0x44d   : > { %v1229_v14 = vpack.c.bf16 %v1228_v12, %v1228_v12 }
 0x44f   : > { %2316 = vmatmul.mubr.msk.bf16.vlgmr.msra.gmra.mrb[20].mxu1 %vm757_vm3, %v1115_v9  ;;  %v1454_v13 = vpop.xlane.xlu0 %1453 }
 0x450   : > { %2326 = vmatpush3.bf16.msra.mxu1 %v2706_v48  ;;  %2327 = vmatprep.mubr.msk.bf16.mxu1 %vm2507_vm1, %v2506_v10  ;;  %2472 = vrcp.f32 %v1454_v13  ;;  %v1390_v13 = vrot.slane %v2742_v59, %v2687_v31 }
 0x451   : > { %2337 = vmatprep.subr.bf16.mxu1 %v2506_v10 }
 0x452   : > { %v2471_v17 = vpop.eup %2470 }
 0x453   : > { %v1342_v18 = vmul.f32 %v2471_v17, %v2455_v39 }
 0x455   : > { %v1343_v19 = vpack.c.bf16 %v1342_v18, %v1342_v18 }
 0x457   : > { %2328 = vmatmul.mubr.msk.bf16.vlgmr.msra.gmra.mrb[24].mxu1 %vm757_vm3, %v1229_v14  ;;  %v1568_v8 = vpop.xlane.xlu1 %1567 }
 0x458   : > { %2338 = vmatpush3.bf16.msra.mxu1 %v2706_v48  ;;  %2339 = vmatprep.mubr.msk.bf16.mxu1 %vm2507_vm1, %v2506_v10  ;;  %2474 = vrcp.f32 %v1568_v8 }
 0x459   : > { %2349 = vmatprep.subr.bf16.mxu1 %v2506_v10 }
 0x45a   : > { %v2473_v15 = vpop.eup %2472 }
 0x45b   : > { %v1456_v20 = vmul.f32 %v2473_v15, %v2801_v44  ;;  %v1504_v15 = vrot.slane %v2755_v1, %v2687_v31  ;;  %v2425_v1 = vld [vmem:[%s2995_s9 + $0x34] ss:$8 sps:$4 sm:$0xff]  }
 0x45d   : > { %v1457_v16 = vpack.c.bf16 %v1456_v20, %v1456_v20 }
 0x45f   : > { %2340 = vmatmul.mubr.msk.bf16.vlgmr.msra.gmra.mrb[28].mxu1 %vm757_vm3, %v1343_v19 }
 0x460   : > { %2350 = vmatpush3.bf16.msra.mxu1 %v2706_v48  ;;  %2351 = vmatprep.mubr.msk.bf16.mxu1 %vm2507_vm1, %v2506_v10 }
 0x461   : > { %2361 = vmatprep.subr.bf16.mxu1 %v2506_v10 }
 0x462   : > { %v2475_v21 = vpop.eup %2474 }
 0x463   : > { %v1570_v22 = vmul.f32 %v2475_v21, %v2805_v46 }
 0x465   : > { %v1571_v23 = vpack.c.bf16 %v1570_v22, %v1570_v22 }
 0x467   : > { %2352 = vmatmul.mubr.msk.bf16.vlgmr.msra.gmra.mrb[32].mxu1 %vm757_vm3, %v1457_v16 }
 0x468   : > { %2362 = vmatpush3.bf16.msra.mxu1 %v2706_v48  ;;  %2363 = vmatprep.mubr.msk.bf16.mxu1 %vm2507_vm1, %v2506_v10  ;;  %v2412_v48 = vld [vmem:[%s2993_s7 + $0x10] sm:$0xff]  }
 0x469   : > { %2372 = vmatpush3.bf16.msra.mxu0 %v2412_v48  ;;  %1769 = vmatprep.subr.bf16.mxu1 %v2416_v32 }
 0x46a   : > { %2373 = vmatprep.subr.bf16.mxu0 %v2506_v10  ;;  %v2417_v10 = vld [vmem:[%s2995_s9 + $0x10] ss:$8 sps:$4 sm:$0xff]  }
 0x46d   : > { %2374 = vmatpush3.bf16.msra.mxu0 %v2413_v29 }
 0x46f   : > { %2364 = vmatmul.mubr.msk.bf16.vlgmr.msra.gmra.mrb[36].mxu1 %vm757_vm3, %v1571_v23 }
 0x470   : > { %1770 = vmatpush1.bf16.msra.mxu1 %v2414_v30  ;;  %1801 = vmatprep.mubr.bf16.mxu1 %v2508_v6 }
 0x471   : > { %1771 = vmatprep.subr.bf16.mxu1 %v2419_v33 }
 0x474   : > { %1772 = vmatpush1.bf16.msra.mxu1 %v2417_v10  ;;  %v2423_v10 = vld [vmem:[%s2995_s9 + $0x30] ss:$8 sps:$4 sm:$0xff]  }
 0x475   : > { %1773 = vmatprep.subr.bf16.mxu1 %v2422_v35  ;;  %v2426_v35 = vld [vmem:[%s2997_s11 + $0x40] sm:$0xff]  }
 0x476   : > { %2237 = vmatprep.subr.bf16.mxu0 %v2426_v35  ;;  %v2191_v35 = vld [vmem:[%s2999_s13] ss:$0 sm:$0xff] }
 0x478   : > { %1774 = vmatpush1.bf16.msra.mxu1 %v2420_v36  ;;  %v2427_v36 = vld [vmem:[%s2997_s11] sm:$0xff]  }
 0x479   : > { %1775 = vmatprep.subr.bf16.mxu1 %v2425_v1 }
 0x47c   : > { %1776 = vmatpush1.bf16.msra.mxu1 %v2423_v10 }
 0x50a   : > { %v811_v37 = vpop.f32.mrb[8].mxu1 }
 0x50b   : > { %v2281_v38 = vpop.f32.mrb[9].mxu1  ;;  %v821_v44 = vmul.f32 %v820_v41, %v811_v37  ;;  %v2428_v37 = vld [vmem:[%s2997_s11 + $0x48] sm:$0xff]  }
 0x50c   : > { %v814_v39 = vpop.f32.mrb[10].mxu1  ;;  %v2429_v38 = vld [vmem:[%s2997_s11 + $0x8] sm:$0xff]  }
 0x50d   : > { %v2282_v40 = vpop.f32.mrb[11].mxu1  ;;  %v2159_v39 = vld [vmem:[%s2994_s8] ss:$0 sm:$0xff] }
 0x512   : > { %v925_v43 = vpop.f32.mrb[12].mxu1 }
 0x513   : > { %v935_v45 = vmul.f32 %v934_v42, %v925_v43  ;;  %v2293_v46 = vpop.f32.mrb[13].mxu1 }
 0x514   : > { %v928_v47 = vpop.f32.mrb[14].mxu1 }
 0x515   : > { %v936_v50 = vadd.f32 %v935_v45, %v821_v44  ;;  %v2294_v51 = vpop.f32.mrb[15].mxu1  ;;  %v2430_v47 = vld [vmem:[%s2997_s11 + $0x50] sm:$0xff]  }
 0x516   : > { %v2432_v51 = vld [vmem:[%s2997_s11 + $0x58] sm:$0xff]  }
 0x51a   : > { %v1039_v53 = vpop.f32.mrb[16].mxu1 }
 0x51b   : > { %v1049_v55 = vmul.f32 %v1048_v52, %v1039_v53  ;;  %v2305_v56 = vpop.f32.mrb[17].mxu1  ;;  %v2434_v52 = vld [vmem:[%s2997_s11 + $0x60] sm:$0xff]  }
 0x51c   : > { %v1042_v57 = vpop.f32.mrb[18].mxu1  ;;  %v2435_v53 = vld [vmem:[%s2997_s11 + $0x20] sm:$0xff]   ;;  %v2437_v56 = vld [vmem:[%s2997_s11 + $0x28] sm:$0xff]  }
 0x51d   : > { %v1050_v58 = vadd.f32 %v1049_v55, %v936_v50  ;;  %v2306_v60 = vpop.f32.mrb[19].mxu1  ;;  %v2431_v50 = vld [vmem:[%s2997_s11 + $0x10] sm:$0xff]   ;;  %v2436_v55 = vld [vmem:[%s2997_s11 + $0x68] sm:$0xff]  }
 0x51e   : > { %v2438_v57 = vld [vmem:[%s2997_s11 + $0x70] sm:$0xff]   ;;  %v2440_v60 = vld [vmem:[%s2997_s11 + $0x78] sm:$0xff]  }
 0x522   : > { %v1153_v26 = vpop.f32.mrb[20].mxu1 }
 0x523   : > { %v1163_v61 = vmul.f32 %v1162_v25, %v1153_v26  ;;  %v2317_v62 = vpop.f32.mrb[21].mxu1  ;;  %v2441_v25 = vld [vmem:[%s2997_s11 + $0x38] sm:$0xff]   ;;  %v1714_v26 = vld [vmem:[%s2996_s10] sm:$0x3] }
 0x524   : > { %v1156_v63 = vpop.f32.mrb[22].mxu1  ;;  %v1719_v62 = vrot.slane %v1714_v26, %v2687_v31 }
 0x525   : > { %v1164_v2 = vadd.f32 %v1163_v61, %v1050_v58  ;;  %v2318_v3 = vpop.f32.mrb[23].mxu1  ;;  %v2439_v58 = vld [vmem:[%s2997_s11 + $0x30] sm:$0xff]   ;;  %v1722_v61 = vsub.s32 1, %v2682_v28 }
 0x527   : > { %v1723_v63 = vrot.slane %v1714_v26, %v1722_v61 }
 0x52a   : > { %v1267_v5 = vpop.f32.mrb[24].mxu1 }
 0x52b   : > { %v1277_v34 = vmul.f32 %v1276_v4, %v1267_v5  ;;  %v2329_v7 = vpop.f32.mrb[25].mxu1 }
 0x52c   : > { %v1270_v9 = vpop.f32.mrb[26].mxu1 }
 0x52d   : > { %v1278_v11 = vadd.f32 %v1277_v34, %v1164_v2  ;;  %v2330_v12 = vpop.f32.mrb[27].mxu1 }
 0x532   : > { %v1381_v14 = vpop.f32.mrb[28].mxu1 }
 0x533   : > { %v1391_v49 = vmul.f32 %v1390_v13, %v1381_v14  ;;  %v2341_v17 = vpop.f32.mrb[29].mxu1 }
 0x534   : > { %v1384_v18 = vpop.f32.mrb[30].mxu1 }
 0x535   : > { %v1392_v8 = vadd.f32 %v1391_v49, %v1278_v11  ;;  %v2342_v19 = vpop.f32.mrb[31].mxu1 }
 0x53a   : > { %v1495_v20 = vpop.f32.mrb[32].mxu1 }
 0x53b   : > { %v1505_v54 = vmul.f32 %v1504_v15, %v1495_v20  ;;  %v2353_v16 = vpop.f32.mrb[33].mxu1  ;;  %v2174_v20 = vld [vmem:[%s2998_s12] ss:$0 sm:$0xff] }
 0x53c   : > { %v1498_v21 = vpop.f32.mrb[34].mxu1 }
 0x53d   : > { %v1506_v22 = vadd.f32 %v1505_v54, %v1392_v8  ;;  %v2354_v23 = vpop.f32.mrb[35].mxu1 }
 0x542   : > { %v1609_v27 = vpop.f32.mrb[36].mxu1 }
 0x543   : > { %v1619_v59 = vmul.f32 %v1618_v24, %v1609_v27  ;;  %v2365_v48 = vpop.f32.mrb[37].mxu1 }
 0x544   : > { %v1612_v29 = vpop.f32.mrb[38].mxu1 }
 0x545   : > { %v1620_v30 = vadd.f32 %v1619_v59, %v1506_v22  ;;  %v2366_v32 = vpop.f32.mrb[39].mxu1 }
 0x547   : > { %v1621_v33 = vpack.c.bf16 %v1620_v30, %v1620_v30 }
 0x549   : > { %2376 = vmatmul.mubr.msk.bf16.vlgmr.msra.gmra.mrb[28].mxu0 %vm588_vm0, %v1621_v33 }
 0x54a   : > { %2238 = vmatpush3.bf16.msra.mxu0 %v2427_v36 }
 0x54b   : > { %2239 = vmatprep.subr.bf16.mxu0 %v2428_v37  ;;  %v2192_v37 = vld [vmem:[%s3000_s14] ss:$0 sm:$0xff] }
 0x54e   : > { %2240 = vmatpush3.bf16.msra.mxu0 %v2429_v38 }
 0x54f   : > { %2241 = vmatprep.subr.bf16.mxu0 %v2430_v47 }
 0x552   : > { %2242 = vmatpush3.bf16.msra.mxu0 %v2431_v50 }
 0x553   : > { %2243 = vmatprep.subr.bf16.mxu0 %v2432_v51 }
 0x61c   : > { %v1698_v40 = vpop.f32.mrb[28].mxu0 }
 0x61d   : > { %v1699_v41 = vadd.f32 %v2159_v39, %v1698_v40  ;;  %v2377_v42 = vpop.f32.mrb[29].mxu0 }
 0x61e   : > { %v1701_v43 = vpop.f32.mrb[30].mxu0 }
 0x61f   : > { %v1704_v44 = vadd.f32 %v1699_v41, %v2620_v0  ;;  %v2378_v45 = vpop.f32.mrb[31].mxu0  ;;  %v2433_v0 = vld [vmem:[%s2997_s11 + $0x18] sm:$0xff]  }
 0x620   : > { %2244 = vmatpush3.bf16.msra.mxu0 %v2433_v0 }
 0x621   : > { %v1705_v46 = vpack.c.bf16 %v1704_v44, %v1704_v44  ;;  %2245 = vmatprep.subr.bf16.mxu0 %v2434_v52 }
 0x623   : > { %2173 = vmatmul.mubr.msk.bf16.vlgmr.msra.gmra.mrb[40].mxu1 %vm588_vm0, %v1705_v46 }
 0x624   : > { %2246 = vmatpush3.bf16.msra.mxu0 %v2435_v53 }
 0x625   : > { %2247 = vmatprep.subr.bf16.mxu0 %v2436_v55 }
 0x628   : > { %2248 = vmatpush3.bf16.msra.mxu0 %v2437_v56 }
 0x629   : > { %2249 = vmatprep.subr.bf16.mxu0 %v2438_v57 }
 0x62c   : > { %2250 = vmatpush3.bf16.msra.mxu0 %v2439_v58 }
 0x62d   : > { %2251 = vmatprep.subr.bf16.mxu0 %v2440_v60 }
 0x630   : > { %2252 = vmatpush3.bf16.msra.mxu0 %v2441_v25 }
 0x6f6   : > { %v1803_v2 = vpop.f32.mrb[40].mxu1 }
 0x6f7   : > { %v1804_v3 = vadd.f32 %v1803_v2, %v1719_v62  ;;  %v1805_v4 = vpop.f32.mrb[41].mxu1 }
 0x6f8   : > { %v1806_v5 = vadd.f32 %v1805_v4, %v1723_v63  ;;  %v1807_v34 = vpop.f32.mrb[42].mxu1 }
 0x6f9   : > { %v1812_v7 = vmul.f32 0.70710677, %v1804_v3  ;;  %v1808_v9 = vpop.f32.mrb[43].mxu1  ;;  %v1810_v14 = vmul.f32 0.5, %v1804_v3 }
 0x6fa   : > { %v1813_v11 = vmul.f32 0.70710677, %v1806_v5  ;;  %v1811_v17 = vmul.f32 0.5, %v1806_v5 }
 0x6fb   : > { %2476 = verf.f32 %v1812_v7 }
 0x6fc   : > { %2478 = verf.f32 %v1813_v11 }
 0x705   : > { %v2477_v12 = vpop.eup %2476 }
 0x706   : > { %v2479_v13 = vpop.eup %2478  ;;  %v1816_v49 = vadd.f32 1.0, %v2477_v12 }
 0x707   : > { %v1817_v18 = vadd.f32 1.0, %v2479_v13 }
 0x708   : > { %v1818_v28 = vmul.f32 %v1816_v49, %v1810_v14 }
 0x709   : > { %v1819_v8 = vmul.f32 %v1817_v18, %v1811_v17 }
 0x70a   : > { %v1820_v19 = vpack.c.bf16 %v1818_v28, %v1818_v28 }
 0x70b   : > { %v1821_v31 = vpack.c.bf16 %v1819_v8, %v1819_v8 }
 0x70d   : > { %1989 = vmatprep.mubr.bf16.mxu0 %v1821_v31 }
 0x70e   : > { %1990 = vmatmul.mubr.bf16.vlgmr.msra.gmra.mrb[32].mxu0 %v1820_v19 }
 0x7e1   : > { %v2253_v15 = vpop.f32.mrb[32].mxu0 }
 0x7e2   : > { %v2254_v54 = vpop.f32.mrb[33].mxu0 }
 0x7e3   : > { %v2255_v16 = vadd.f32 %v2254_v54, %v2253_v15  ;;  %v2256_v21 = vpop.f32.mrb[34].mxu0 }
 0x7e4   : > { %v2257_v22 = vpop.f32.mrb[35].mxu0 }
 0x7e5   : > { %v1992_v23 = vadd.f32 %v2255_v16, %v2174_v20 }
 0x7e7   : > { %v1997_v24 = vadd.f32 %v1992_v23, %v1704_v44 }
 0x7e9   : > { %v2000_v27 = vsel %vm588_vm0, %v1997_v24, 0.0 }
 0x7ea   : > { %2001 = vadd.xlane.f32.xlu0 %v2000_v27 }
 0x877   : > { %v2002_v59 = vpop.xlane.xlu0 %2001 }
 0x878   : > { %v2003_v48 = vmul.f32 0.015625, %v2002_v59 }
 0x87a   : > { %v2004_v29 = vsub.f32 %v1997_v24, %v2003_v48 }
 0x87c   : > { %v2005_v30 = vmul.f32 %v2004_v29, %v2004_v29 }
 0x87e   : > { %v2006_v32 = vsel %vm588_vm0, %v2005_v30, 0.0 }
 0x87f   : > { %2007 = vadd.xlane.f32.xlu1 %v2006_v32 }
 0x90c   : > { %v2008_v33 = vpop.xlane.xlu1 %2007 }
 0x90d   : > { %v2009_v1 = vmul.f32 0.015625, %v2008_v33 }
 0x90f   : > { %v2010_v10 = vadd.f32 1e-05, %v2009_v1 }
 0x911   : > { %2480 = vrsqrt.f32 %v2010_v10 }
 0x91b   : > { %v2481_v6 = vpop.eup %2480 }
 0x91c   : > { %v2012_v36 = vmul.f32 %v2481_v6, %v2004_v29 }
 0x91e   : > { %v2019_v38 = vmul.f32 %v2191_v35, %v2012_v36 }
 0x920   : > { %v2026_v39 = vadd.f32 %v2192_v37, %v2019_v38 }
 0x922   : > { %2027 = vst.msk [vmem:[%s581_s27] sm:$0xff] %vm588_vm0, %v2026_v39 }
 0x923 PF: > { %s26_s23 = sadd.s32 1, %s2504_s23   ;;  %s3005_s21 = smov %s2500_s22 }
 0x924   : > { %p23_p5 = scmp.ge.s32.totalorder %s26_s23, 4   ;;  %s3006_s22 = smov %s3008_s24 }
 0x926   :  { %25 = sbr.rel (!%p23_p5) target bundleno = 2 (0x2), region = 120 }

</bundles_post_ra>
